<compile_context>
chip_gen: v7x
topology: tpu7x:2x2x1
jax: 0.10.0
libtpu: 0.0.40
codegen_flags: <defaults>
</compile_context>

<pallas_src>
import functools

import jax
import jax.numpy as jnp
from jax.experimental import pallas as pl
from jax.experimental.pallas import tpu as pltpu

NEG_SLOPE = 0.01              # nn.LeakyReLU default negative_slope
BN_EPS = 1e-5                 # nn.BatchNorm2d default eps
MATMUL_DTYPE = jnp.bfloat16   # MXU-native on v5e/v6e/v7x; accumulation stays f32


def _round_up(x, m):
    return (x + m - 1) // m * m


# -------- fused kernel: in-kernel pad + width-im2col, KH fat matmuls, folded BN + LeakyReLU ------

def _conv_bn_lrelu_kernel(x_ref, w_ref, scale_ref, shift_ref, o_ref, xw_ref, acc_ref,
                          *, KH, KW, H, W, Ho, Wo, Cin, Cout, pad):
    # x_ref:     (1, H, W, Cin)       unpadded NHWC activations (bf16), one image
    # w_ref:     (KH, KW*Cin, CoutP)  one fat (K = KW*Cin) weight matrix per kernel row
    # scale_ref: (1, CoutP)           folded BN scale  gamma / sqrt(var + eps)
    # shift_ref: (1, CoutP)           folded conv-bias + BN shift
    # o_ref:     (1, Cout, Ho*Wo)     NCHW-ordered output (lane-dense last dim)
    # xw_ref:    (Hp, Wo, KW*Cin)     VMEM scratch: zero-padded width-only im2col
    # acc_ref:   (Ho*Wo, CoutP)       VMEM f32 accumulator
    K = KW * Cin
    M = Ho * Wo

    # ---- in-kernel zero padding + width-only im2col (KW tile-aligned sliced copies) ----
    xw_ref[...] = jnp.zeros_like(xw_ref)               # re-zero every step (scratch is per-core)
    for kw in range(KW):                                # static unroll
        wo_lo = max(0, pad - kw)
        wo_hi = min(Wo, pad + W - kw)
        if wo_hi > wo_lo:
            xw_ref[pad:pad + H, wo_lo:wo_hi, kw * Cin:(kw + 1) * Cin] = (
                x_ref[0, :, wo_lo + kw - pad:wo_hi + kw - pad, :])

    # ---- KH accumulating MXU matmuls with K = KW*Cin; accumulate in VMEM, not registers ----
    for kh in range(KH):                                # static unroll
        lhs = xw_ref[kh:kh + Ho, :, :].reshape(M, K)    # contiguous row-block, lane axis unchanged
        contrib = jnp.dot(lhs, w_ref[kh], preferred_element_type=jnp.float32)
        if kh == 0:
            acc_ref[...] = contrib
        else:
            acc_ref[...] += contrib

    # ---- folded BatchNorm (inference) + LeakyReLU, then XLU transpose to (Cout, Ho*Wo) ----
    y = acc_ref[...] * scale_ref[...] + shift_ref[...]
    y = jnp.maximum(y, NEG_SLOPE * y)                   # LeakyReLU as one VALU max
    o_ref[0, :, :] = jnp.transpose(y)[:Cout, :].astype(o_ref.dtype)


# -------- wrapper (only: NHWC/bf16 cast, weight repack, BN fold; output reshape is metadata) ----

def load_kernel_network_forward(x, params, *, stride=1, padding=1):
    assert stride == 1, "kernel implements the module defaults (stride=1)"
    N, Cin, H, W = x.shape
    w = params["conv_w"]                                # == kernel_tensor, (Cout, Cin, KH, KW)
    Cout, _, KH, KW = w.shape
    Ho = H + 2 * padding - KH + 1
    Wo = W + 2 * padding - KW + 1
    Hp = H + 2 * padding
    M = Ho * Wo
    K = KW * Cin
    CoutP = _round_up(Cout, 128)                        # lane-dense matmul output channels

    # NCHW -> NHWC + bf16 cast (one fused XLA op). Padding & im2col happen inside the kernel.
    x_nhwc = jnp.transpose(x, (0, 2, 3, 1)).astype(MATMUL_DTYPE)

    # (Cout, Cin, KH, KW) -> (KH, KW*Cin, CoutP): one fat matrix per kernel row, contraction
    # axis ordered (kw, cin) to match the im2col lane layout.
    w_k = jnp.transpose(w, (2, 3, 1, 0)).reshape(KH, K, Cout)
    w_k = jnp.pad(w_k, ((0, 0), (0, 0), (0, CoutP - Cout))).astype(MATMUL_DTYPE)

    # Fold conv bias + BatchNorm2d (inference, running stats) into per-channel scale/shift.
    s = params["bn_gamma"] / jnp.sqrt(params["bn_var"] + BN_EPS)
    c = (params["conv_b"] - params["bn_mean"]) * s + params["bn_beta"]
    scale = jnp.pad(s, (0, CoutP - Cout)).astype(jnp.float32)[None, :]
    shift = jnp.pad(c, (0, CoutP - Cout)).astype(jnp.float32)[None, :]

    out = pl.pallas_call(
        functools.partial(_conv_bn_lrelu_kernel, KH=KH, KW=KW, H=H, W=W,
                          Ho=Ho, Wo=Wo, Cin=Cin, Cout=Cout, pad=padding),
        out_shape=jax.ShapeDtypeStruct((N, Cout, M), jnp.float32),
        grid_spec=pltpu.PrefetchScalarGridSpec(
            num_scalar_prefetch=0,
            grid=(N,),                                  # one image per step; parallel -> both TCs
            in_specs=[
                pl.BlockSpec((1, H, W, Cin), lambda n: (n, 0, 0, 0)),
                pl.BlockSpec((KH, K, CoutP), lambda n: (0, 0, 0)),    # grid-invariant weights
                pl.BlockSpec((1, CoutP), lambda n: (0, 0)),
                pl.BlockSpec((1, CoutP), lambda n: (0, 0)),
            ],
            out_specs=pl.BlockSpec((1, Cout, M), lambda n: (n, 0, 0)),
            scratch_shapes=[
                pltpu.VMEM((Hp, Wo, K), MATMUL_DTYPE),  # zero-padded width-im2col buffer
                pltpu.VMEM((M, CoutP), jnp.float32),    # conv accumulator
            ],
        ),
        compiler_params=pltpu.CompilerParams(
            dimension_semantics=("parallel",)),
    )(x_nhwc, w_k, scale, shift)

    # (N, Cout, Ho*Wo) -> (N, Cout, Ho, Wo): metadata-only reshape, no extra HBM round trip.
    return out.reshape(N, Cout, Ho, Wo)


# -------- deterministic parameter init --------

def init_params(key, cin, cout, kh=3, kw=3):
    k = jax.random.split(key, 6)
    return {
        # plays the role of the user-supplied `kernel_tensor`
        "conv_w": jax.random.normal(k[0], (cout, cin, kh, kw), jnp.float32)
                  * (2.0 / (cin * kh * kw)) ** 0.5,
        "conv_b": 0.01 * jax.random.normal(k[1], (cout,), jnp.float32),
        "bn_gamma": 1.0 + 0.1 * jax.random.normal(k[2], (cout,), jnp.float32),
        "bn_beta": 0.1 * jax.random.normal(k[3], (cout,), jnp.float32),
        "bn_mean": 0.1 * jax.random.normal(k[4], (cout,), jnp.float32),
        "bn_var": 1.0 + 0.1 * jax.random.uniform(k[5], (cout,), jnp.float32),
    }


# -------- pure-JAX f32 reference (silent correctness check) --------

def reference_forward(x, params):
    y = jax.lax.conv_general_dilated(
        x, params["conv_w"], window_strides=(1, 1), padding=((1, 1), (1, 1)),
        dimension_numbers=("NCHW", "OIHW", "NCHW"))
    y = y + params["conv_b"][None, :, None, None]
    s = (params["bn_gamma"] / jnp.sqrt(params["bn_var"] + BN_EPS))[None, :, None, None]
    y = (y - params["bn_mean"][None, :, None, None]) * s + params["bn_beta"][None, :, None, None]
    return jnp.where(y > 0, y, NEG_SLOPE * y)


if __name__ == "__main__":
    key = jax.random.PRNGKey(0)
    kx, kp = jax.random.split(key)
    # Small but lane-friendly shapes: batch=2, 128 channels in/out, 16x16 spatial, 3x3 kernel.
    N, Cin, H, W = 2, 128, 16, 16
    Cout, KH, KW = 128, 3, 3
    x = jax.random.normal(kx, (N, Cin, H, W), jnp.float32)
    params = init_params(kp, Cin, Cout, KH, KW)

    out = jax.block_until_ready(jax.jit(load_kernel_network_forward)(x, params))
    ref = reference_forward(x, params)

    assert out.shape == (N, Cout, H, W), out.shape
    # bf16 operands (f32 accumulation) -> slightly looser tolerance than the f32-matmul version.
    err = float(jnp.max(jnp.abs(out - ref)))
    assert jnp.allclose(out, ref, rtol=2e-2, atol=2e-2), err
    print("KERNEL_OK")
</pallas_src>

<mosaic_0001>
module attributes {stable_mosaic.version = 11 : i64} {
  func.func @_conv_bn_lrelu_kernel(%arg0: i32, %arg1: memref<1x16x16x128xbf16, #tpu.memory_space<vmem>>, %arg2: memref<3x384x128xbf16, #tpu.memory_space<vmem>>, %arg3: memref<1x128xf32, #tpu.memory_space<vmem>>, %arg4: memref<1x128xf32, #tpu.memory_space<vmem>>, %arg5: memref<1x128x256xf32, #tpu.memory_space<vmem>>, %arg6: memref<18x16x384xbf16, #tpu.memory_space<vmem>>, %arg7: memref<256x128xf32, #tpu.memory_space<vmem>>) attributes {dimension_semantics = [#tpu.dimension_semantics<parallel>], iteration_bounds = array<i64: 2>, scalar_prefetch = 0 : i64, scratch_operands = 2 : i64, tpu.core_type = #tpu.core_type<tc>, window_params = [{transform_indices = @transform_0, window_bounds = array<i64: 1, 16, 16, 128>}, {pipeline_mode = #tpu.pipeline_mode<synchronous>, transform_indices = @transform_1, window_bounds = array<i64: 3, 384, 128>}, {pipeline_mode = #tpu.pipeline_mode<synchronous>, transform_indices = @transform_2, window_bounds = array<i64: 1, 128>}, {pipeline_mode = #tpu.pipeline_mode<synchronous>, transform_indices = @transform_3, window_bounds = array<i64: 1, 128>}, {transform_indices = @transform_4, window_bounds = array<i64: 1, 128, 256>}]} {
    %cst = arith.constant 0.000000e+00 : bf16
    %0 = vector.broadcast %cst : bf16 to vector<18x16x384xbf16>
    %c0 = arith.constant 0 : index
    %c0_0 = arith.constant 0 : index
    %c0_1 = arith.constant 0 : index
    %1 = vector.load %arg6[%c0, %c0_0, %c0_1] : memref<18x16x384xbf16, #tpu.memory_space<vmem>>, vector<18x16x384xbf16>
    tpu.vector_store %arg6[%c0, %c0_0, %c0_1], %0 {strides = array<i32>} : memref<18x16x384xbf16, #tpu.memory_space<vmem>>, vector<18x16x384xbf16>,
    %c0_2 = arith.constant 0 : index
    %c0_3 = arith.constant 0 : index
    %c0_4 = arith.constant 0 : index
    %c0_5 = arith.constant 0 : index
    %2 = vector.load %arg1[%c0_2, %c0_3, %c0_4, %c0_5] : memref<1x16x16x128xbf16, #tpu.memory_space<vmem>>, vector<1x16x15x128xbf16>
    %3 = vector.shape_cast %2 : vector<1x16x15x128xbf16> to vector<16x15x128xbf16>
    %c1 = arith.constant 1 : index
    %c1_6 = arith.constant 1 : index
    %c0_7 = arith.constant 0 : index
    %4 = vector.load %arg6[%c1, %c1_6, %c0_7] : memref<18x16x384xbf16, #tpu.memory_space<vmem>>, vector<16x15x128xbf16>
    tpu.vector_store %arg6[%c1, %c1_6, %c0_7], %3 {strides = array<i32>} : memref<18x16x384xbf16, #tpu.memory_space<vmem>>, vector<16x15x128xbf16>,
    %c0_8 = arith.constant 0 : index
    %c0_9 = arith.constant 0 : index
    %c0_10 = arith.constant 0 : index
    %c0_11 = arith.constant 0 : index
    %5 = vector.load %arg1[%c0_8, %c0_9, %c0_10, %c0_11] : memref<1x16x16x128xbf16, #tpu.memory_space<vmem>>, vector<1x16x16x128xbf16>
    %6 = vector.shape_cast %5 : vector<1x16x16x128xbf16> to vector<16x16x128xbf16>
    %c1_12 = arith.constant 1 : index
    %c0_13 = arith.constant 0 : index
    %c128 = arith.constant 128 : index
    %7 = vector.load %arg6[%c1_12, %c0_13, %c128] : memref<18x16x384xbf16, #tpu.memory_space<vmem>>, vector<16x16x128xbf16>
    tpu.vector_store %arg6[%c1_12, %c0_13, %c128], %6 {strides = array<i32>} : memref<18x16x384xbf16, #tpu.memory_space<vmem>>, vector<16x16x128xbf16>,
    %c0_14 = arith.constant 0 : index
    %c0_15 = arith.constant 0 : index
    %c1_16 = arith.constant 1 : index
    %c0_17 = arith.constant 0 : index
    %8 = vector.load %arg1[%c0_14, %c0_15, %c1_16, %c0_17] : memref<1x16x16x128xbf16, #tpu.memory_space<vmem>>, vector<1x16x15x128xbf16>
    %9 = vector.shape_cast %8 : vector<1x16x15x128xbf16> to vector<16x15x128xbf16>
    %c1_18 = arith.constant 1 : index
    %c0_19 = arith.constant 0 : index
    %c256 = arith.constant 256 : index
    %10 = vector.load %arg6[%c1_18, %c0_19, %c256] : memref<18x16x384xbf16, #tpu.memory_space<vmem>>, vector<16x15x128xbf16>
    tpu.vector_store %arg6[%c1_18, %c0_19, %c256], %9 {strides = array<i32>} : memref<18x16x384xbf16, #tpu.memory_space<vmem>>, vector<16x15x128xbf16>,
    %c0_20 = arith.constant 0 : index
    %c0_21 = arith.constant 0 : index
    %c0_22 = arith.constant 0 : index
    %11 = vector.load %arg6[%c0_20, %c0_21, %c0_22] : memref<18x16x384xbf16, #tpu.memory_space<vmem>>, vector<16x16x384xbf16>
    %12 = vector.shape_cast %11 : vector<16x16x384xbf16> to vector<256x384xbf16>
    %c0_23 = arith.constant 0 : index
    %c0_24 = arith.constant 0 : index
    %c0_25 = arith.constant 0 : index
    %13 = vector.load %arg2[%c0_23, %c0_24, %c0_25] : memref<3x384x128xbf16, #tpu.memory_space<vmem>>, vector<1x384x128xbf16>
    %14 = vector.shape_cast %13 : vector<1x384x128xbf16> to vector<384x128xbf16>
    %cst_26 = arith.constant dense<0.000000e+00> : vector<256x128xf32>
    %15 = tpu.matmul %12, %14, %cst_26 {dimension_numbers = #tpu.dot_dimension_numbers<[1], [0], [0], [1], [0, 0, 1, 1], [], []>} : vector<256x384xbf16>, vector<384x128xbf16>, vector<256x128xf32> -> vector<256x128xf32>
    %c0_27 = arith.constant 0 : index
    %c0_28 = arith.constant 0 : index
    %16 = vector.load %arg7[%c0_27, %c0_28] : memref<256x128xf32, #tpu.memory_space<vmem>>, vector<256x128xf32>
    tpu.vector_store %arg7[%c0_27, %c0_28], %15 {strides = array<i32>} : memref<256x128xf32, #tpu.memory_space<vmem>>, vector<256x128xf32>,
    %c1_29 = arith.constant 1 : index
    %c0_30 = arith.constant 0 : index
    %c0_31 = arith.constant 0 : index
    %17 = vector.load %arg6[%c1_29, %c0_30, %c0_31] : memref<18x16x384xbf16, #tpu.memory_space<vmem>>, vector<16x16x384xbf16>
    %18 = vector.shape_cast %17 : vector<16x16x384xbf16> to vector<256x384xbf16>
    %c1_32 = arith.constant 1 : index
    %c0_33 = arith.constant 0 : index
    %c0_34 = arith.constant 0 : index
    %19 = vector.load %arg2[%c1_32, %c0_33, %c0_34] : memref<3x384x128xbf16, #tpu.memory_space<vmem>>, vector<1x384x128xbf16>
    %20 = vector.shape_cast %19 : vector<1x384x128xbf16> to vector<384x128xbf16>
    %cst_35 = arith.constant dense<0.000000e+00> : vector<256x128xf32>
    %21 = tpu.matmul %18, %20, %cst_35 {dimension_numbers = #tpu.dot_dimension_numbers<[1], [0], [0], [1], [0, 0, 1, 1], [], []>} : vector<256x384xbf16>, vector<384x128xbf16>, vector<256x128xf32> -> vector<256x128xf32>
    %c0_36 = arith.constant 0 : index
    %c0_37 = arith.constant 0 : index
    %22 = vector.load %arg7[%c0_36, %c0_37] : memref<256x128xf32, #tpu.memory_space<vmem>>, vector<256x128xf32>
    %23 = arith.addf %22, %21 : vector<256x128xf32>
    %c0_38 = arith.constant 0 : index
    %c0_39 = arith.constant 0 : index
    %24 = vector.load %arg7[%c0_38, %c0_39] : memref<256x128xf32, #tpu.memory_space<vmem>>, vector<256x128xf32>
    tpu.vector_store %arg7[%c0_38, %c0_39], %23 {strides = array<i32>} : memref<256x128xf32, #tpu.memory_space<vmem>>, vector<256x128xf32>,
    %c2 = arith.constant 2 : index
    %c0_40 = arith.constant 0 : index
    %c0_41 = arith.constant 0 : index
    %25 = vector.load %arg6[%c2, %c0_40, %c0_41] : memref<18x16x384xbf16, #tpu.memory_space<vmem>>, vector<16x16x384xbf16>
    %26 = vector.shape_cast %25 : vector<16x16x384xbf16> to vector<256x384xbf16>
    %c2_42 = arith.constant 2 : index
    %c0_43 = arith.constant 0 : index
    %c0_44 = arith.constant 0 : index
    %27 = vector.load %arg2[%c2_42, %c0_43, %c0_44] : memref<3x384x128xbf16, #tpu.memory_space<vmem>>, vector<1x384x128xbf16>
    %28 = vector.shape_cast %27 : vector<1x384x128xbf16> to vector<384x128xbf16>
    %cst_45 = arith.constant dense<0.000000e+00> : vector<256x128xf32>
    %29 = tpu.matmul %26, %28, %cst_45 {dimension_numbers = #tpu.dot_dimension_numbers<[1], [0], [0], [1], [0, 0, 1, 1], [], []>} : vector<256x384xbf16>, vector<384x128xbf16>, vector<256x128xf32> -> vector<256x128xf32>
    %c0_46 = arith.constant 0 : index
    %c0_47 = arith.constant 0 : index
    %30 = vector.load %arg7[%c0_46, %c0_47] : memref<256x128xf32, #tpu.memory_space<vmem>>, vector<256x128xf32>
    %31 = arith.addf %30, %29 : vector<256x128xf32>
    %c0_48 = arith.constant 0 : index
    %c0_49 = arith.constant 0 : index
    %32 = vector.load %arg7[%c0_48, %c0_49] : memref<256x128xf32, #tpu.memory_space<vmem>>, vector<256x128xf32>
    tpu.vector_store %arg7[%c0_48, %c0_49], %31 {strides = array<i32>} : memref<256x128xf32, #tpu.memory_space<vmem>>, vector<256x128xf32>,
    %c0_50 = arith.constant 0 : index
    %c0_51 = arith.constant 0 : index
    %33 = vector.load %arg7[%c0_50, %c0_51] : memref<256x128xf32, #tpu.memory_space<vmem>>, vector<256x128xf32>
    %c0_52 = arith.constant 0 : index
    %c0_53 = arith.constant 0 : index
    %34 = vector.load %arg3[%c0_52, %c0_53] : memref<1x128xf32, #tpu.memory_space<vmem>>, vector<1x128xf32>
    %35 = vector.broadcast %34 : vector<1x128xf32> to vector<256x128xf32>
    %36 = arith.mulf %33, %35 : vector<256x128xf32>
    %c0_54 = arith.constant 0 : index
    %c0_55 = arith.constant 0 : index
    %37 = vector.load %arg4[%c0_54, %c0_55] : memref<1x128xf32, #tpu.memory_space<vmem>>, vector<1x128xf32>
    %38 = vector.broadcast %37 : vector<1x128xf32> to vector<256x128xf32>
    %39 = arith.addf %36, %38 : vector<256x128xf32>
    %cst_56 = arith.constant 0.00999999977 : f32
    %40 = vector.broadcast %cst_56 : f32 to vector<256x128xf32>
    %41 = arith.mulf %40, %39 : vector<256x128xf32>
    %42 = arith.maximumf %39, %41 : vector<256x128xf32>
    %43 = tpu.transpose %42, [1, 0] : vector<256x128xf32> -> vector<128x256xf32>
    %c0_57 = arith.constant 0 : index
    %c0_58 = arith.constant 0 : index
    %c0_59 = arith.constant 0 : index
    %44 = vector.load %arg5[%c0_57, %c0_58, %c0_59] : memref<1x128x256xf32, #tpu.memory_space<vmem>>, vector<1x128x256xf32>
    %45 = vector.shape_cast %44 : vector<1x128x256xf32> to vector<128x256xf32>
    %46 = vector.shape_cast %43 : vector<128x256xf32> to vector<1x128x256xf32>
    tpu.vector_store %arg5[%c0_57, %c0_58, %c0_59], %46 {strides = array<i32>} : memref<1x128x256xf32, #tpu.memory_space<vmem>>, vector<1x128x256xf32>,
    return
  }
  func.func @transform_0(%arg0: i32) -> (i32, i32, i32, i32) {
    %c0_i32 = arith.constant 0 : i32
    %c0_i32_0 = arith.constant 0 : i32
    %c0_i32_1 = arith.constant 0 : i32
    %c0_i32_2 = arith.constant 0 : i32
    return %arg0, %c0_i32, %c0_i32_0, %c0_i32_1 : i32, i32, i32, i32
  }
  func.func @transform_1(%arg0: i32) -> (i32, i32, i32) {
    %c0_i32 = arith.constant 0 : i32
    %c0_i32_0 = arith.constant 0 : i32
    %c0_i32_1 = arith.constant 0 : i32
    %c0_i32_2 = arith.constant 0 : i32
    return %c0_i32, %c0_i32_0, %c0_i32_1 : i32, i32, i32
  }
  func.func @transform_2(%arg0: i32) -> (i32, i32) {
    %c0_i32 = arith.constant 0 : i32
    %c0_i32_0 = arith.constant 0 : i32
    %c0_i32_1 = arith.constant 0 : i32
    return %c0_i32, %c0_i32_0 : i32, i32
  }
  func.func @transform_3(%arg0: i32) -> (i32, i32) {
    %c0_i32 = arith.constant 0 : i32
    %c0_i32_0 = arith.constant 0 : i32
    %c0_i32_1 = arith.constant 0 : i32
    return %c0_i32, %c0_i32_0 : i32, i32
  }
  func.func @transform_4(%arg0: i32) -> (i32, i32, i32) {
    %c0_i32 = arith.constant 0 : i32
    %c0_i32_0 = arith.constant 0 : i32
    %c0_i32_1 = arith.constant 0 : i32
    return %arg0, %c0_i32, %c0_i32_0 : i32, i32, i32
  }
}

</mosaic_0001>

<bundles_post_ra>
// kernel: load_kernel_network_forward.1
= control target key start
LH: loop header
LB: loop body
LE: loop exit
PB: predicated region body
PF: predicated region fallthrough
CT: control target
= control target key end

     0   :  { %s4339_s15 = smov 0   ;;  %s5412_s0 = inlined_call_operand.vmem [shape: bf16[2,16,16,128], index: 0, kind: input, shape index: {}]   ;;  %s5413_s1 = inlined_call_operand.vmem [shape: bf16[3,384,128], index: 1, kind: input, shape index: {}]   ;;  %s5414_s2 = inlined_call_operand.vmem [shape: f32[1,128], index: 2, kind: input, shape index: {}]   ;;  %s5415_s3 = inlined_call_operand.vmem [shape: f32[1,128], index: 3, kind: input, shape index: {}]   ;;  %s5416_s4 = inlined_call_operand.vmem [shape: f32[2,128,256], index: 4, kind: output, shape index: {}]  }
   0x1 LB: > { %s3217_s16 = sadd.s32 4294967295, %s4311_s15   ;;  %p3221_p0 = scmp.ge.s32.totalorder %s4311_s15, 1  ;;  %s4311_s15 = sphi %s4339_s15, %s14_s15  }
   0x2   : > { %p162_p1 = scmp.lt.s32.totalorder %s4311_s15, 3 }
   0x4   : > { %p163_p2 = pnand %p3221_p0, %p162_p1 }
   0x6   : > { %166 = sbr.rel (%p163_p2) target bundleno = 716 (0x2cc), region = 36 }
   0xd   : > { %v4185_v0 = vld [vmem:[%s5413_s1 + $0x40] sm:$0xff]   ;;  %v4313_v2 = vmov 0   ;;  %v4188_v4 = vld [vmem:[%s5413_s1 + $0x48] sm:$0xff]   ;;  %v4191_v7 = vld [vmem:[%s5413_s1 + $0x50] sm:$0xff]   ;;  %p188_p3 = scmp.lt.s32.totalorder %s3217_s16, 1  ;;  %vm494_vm0 = vcmask 1047552  }
   0xe   : > { %v4353_v1 = vld [vmem:[%s5413_s1 + $0x80] sm:$0xff]   ;;  %1251 = vmatprep.mubr.bf16.mxu0 %v4313_v2  ;;  %3448 = vmatprep.subr.bf16.mxu0 %v4185_v0  ;;  %v4367_v5 = vld [vmem:[%s5413_s1 + $0x88] sm:$0xff]   ;;  %v4379_v8 = vld [vmem:[%s5413_s1 + $0x90] sm:$0xff]   ;;  %vm929_vm1 = vsmask.f32 7424 }
   0xf   : > { %v4187_v3 = vld [vmem:[%s5413_s1] sm:$0xff]   ;;  %4000 = vmatprep.subr.bf16.mxu1 %v4353_v1  ;;  %v4190_v6 = vld [vmem:[%s5413_s1 + $0x8] sm:$0xff]   ;;  %v4193_v9 = vld [vmem:[%s5413_s1 + $0x10] sm:$0xff]   ;;  %s5424_s16 = smov (!%p188_p3, %s3217_s16), 1  ;;  %vm495_vm3 = vsmask.f32 7938 }
  0x10   : > { %3449 = vmatpush3.bf16.msra.mxu0 %v4187_v3  ;;  %4008 = vmatpush3.bf16.msra.mxu1 %v4353_v1  ;;  %v4194_v10 = vld [vmem:[%s5413_s1 + $0x58] sm:$0xff]   ;;  %v4197_v13 = vld [vmem:[%s5413_s1 + $0x60] sm:$0xff]   ;;  %v4200_v16 = vld [vmem:[%s5413_s1 + $0x68] sm:$0xff]   ;;  %s3446_s27 = sshll.u32 %s5424_s16, 7  ;;  %s3447_s28 = sshll.u32 %s5424_s16, 8 }
  0x11   : > { %3450 = vmatprep.subr.bf16.mxu0 %v4188_v4  ;;  %4001 = vmatprep.subr.bf16.mxu1 %v4367_v5  ;;  %v4392_v11 = vld [vmem:[%s5413_s1 + $0x98] sm:$0xff]   ;;  %v4407_v14 = vld [vmem:[%s5413_s1 + $0xa0] sm:$0xff]   ;;  %v4424_v17 = vld [vmem:[%s5413_s1 + $0xa8] sm:$0xff]   ;;  %s4443_s10 = scalar_lea.vmem %s5412_s0, %s3446_s27  ;;  %s5375_s5 = scalar_lea.vmem %s5416_s4, %s3447_s28 }
  0x12   : > { %v4196_v12 = vld [vmem:[%s5413_s1 + $0x18] sm:$0xff]   ;;  %v4199_v15 = vld [vmem:[%s5413_s1 + $0x20] sm:$0xff]   ;;  %v4202_v18 = vld [vmem:[%s5413_s1 + $0x28] sm:$0xff]  }
  0x13   : > { %v4203_v19 = vld [vmem:[%s5413_s1 + $0x70] sm:$0xff]   ;;  %v4206_v22 = vld [vmem:[%s5413_s1 + $0x78] sm:$0xff]   ;;  %v4210_v27 = vld [vmem:[%s4443_s10 + $0x40] sm:$0xff]  }
  0x14   : > { %3451 = vmatpush3.bf16.msra.mxu0 %v4190_v6  ;;  %4009 = vmatpush3.bf16.msra.mxu1 %v4367_v5  ;;  %v4438_v20 = vld [vmem:[%s5413_s1 + $0xb0] sm:$0xff]   ;;  %v4454_v23 = vld [vmem:[%s5413_s1 + $0xb8] sm:$0xff]   ;;  %vm4465_vm2 = vmand %vm494_vm0, %vm929_vm1  ;;  %v858_v31 = vshrl.u32 %v4210_v27, 16  ;;  %v860_v32 = vshll.u32 %v4210_v27, 16 }
  0x15   : > { %3452 = vmatprep.subr.bf16.mxu0 %v4191_v7  ;;  %4002 = vmatprep.subr.bf16.mxu1 %v4379_v8  ;;  %v4205_v21 = vld [vmem:[%s5413_s1 + $0x30] sm:$0xff]   ;;  %v4209_v24 = vld [vmem:[%s4443_s10 + $0x38] sm:$0xff]   ;;  %v4211_v33 = vld [vmem:[%s5413_s1 + $0x100] sm:$0xff]  }
  0x16   : > { %v851_v25 = vshrl.u32 %v4209_v24, 16  ;;  %v853_v26 = vshll.u32 %v4209_v24, 16  ;;  %v4208_v28 = vld [vmem:[%s5413_s1 + $0x38] sm:$0xff]   ;;  %v862_v35 = vrot.slane %v860_v32, 1  ;;  %v4212_v36 = vld [vmem:[%s5413_s1 + $0xc0] sm:$0xff]   ;;  %v4213_v37 = vld [vmem:[%s5413_s1 + $0x108] sm:$0xff]  }
  0x17   : > { %v4480_v38 = vld [vmem:[%s4443_s10] sm:$0xff]   ;;  %v4216_v41 = vld [vmem:[%s4443_s10 + $0x48] sm:$0xff]   ;;  %v4218_v46 = vld [vmem:[%s4443_s10 + $0x50] sm:$0xff]  }
  0x18   : > { %3453 = vmatpush3.bf16.msra.mxu0 %v4193_v9  ;;  %4010 = vmatpush3.bf16.msra.mxu1 %v4379_v8  ;;  %v855_v29 = vrot.slane %v853_v26, 1  ;;  %v863_v40 = vor.u32 %v862_v35, %v858_v31  ;;  %v4217_v42 = vld [vmem:[%s4443_s10] sm:$0xff]   ;;  %v865_v44 = vshrl.u32 %v4216_v41, 16  ;;  %v867_v45 = vshll.u32 %v4216_v41, 16  ;;  %v4214_v49 = vld [vmem:[%s5413_s1 + $0xc8] sm:$0xff]   ;;  %vm4503_vm4 = vmand %vm494_vm0, %vm495_vm3 }
  0x19   : > { %3454 = vmatprep.subr.bf16.mxu0 %v4194_v10  ;;  %4003 = vmatprep.subr.bf16.mxu1 %v4392_v11  ;;  %v366_v47 = vshrl.u32 %v4217_v42, 16  ;;  %v369_v48 = vshll.u32 %v4217_v42, 16  ;;  %v872_v52 = vshrl.u32 %v4218_v46, 16  ;;  %v874_v53 = vshll.u32 %v4218_v46, 16  ;;  %v4219_v55 = vld [vmem:[%s5413_s1 + $0x110] sm:$0xff]   ;;  %v4221_v62 = vld [vmem:[%s5413_s1 + $0x118] sm:$0xff]  }
  0x1a   : > { %v856_v34 = vor.u32 %v855_v29, %v851_v25  ;;  %v4492_v43 = vsel %vm4465_vm2, %v863_v40, 0  ;;  %v869_v50 = vrot.slane %v867_v45, 1  ;;  %v4220_v58 = vld [vmem:[%s5413_s1 + $0xd0] sm:$0xff]   ;;  %v4528_v0 = vld [vmem:[%s4443_s10 + $0x8] sm:$0xff]   ;;  %v4222_v3 = vld [vmem:[%s5413_s1 + $0xd8] sm:$0xff]  }
  0x1b   : > { %v368_v54 = vrot.slane %v366_v47, 7  ;;  %v876_v57 = vrot.slane %v874_v53, 1  ;;  %v4224_v4 = vld [vmem:[%s4443_s10 + $0x58] sm:$0xff]   ;;  %v4225_v6 = vld [vmem:[%s4443_s10 + $0x8] sm:$0xff]   ;;  %v4226_v10 = vld [vmem:[%s4443_s10 + $0x60] sm:$0xff]  }
  0x1c   : > { %3455 = vmatpush3.bf16.msra.mxu0 %v4196_v12  ;;  %4011 = vmatpush3.bf16.msra.mxu1 %v4392_v11  ;;  %v4485_v39 = vsel %vm4465_vm2, %v856_v34, 0  ;;  %v870_v56 = vor.u32 %v869_v50, %v865_v44  ;;  %v879_v7 = vshrl.u32 %v4224_v4, 16  ;;  %v881_v9 = vshll.u32 %v4224_v4, 16  ;;  %v4227_v12 = vld [vmem:[%s5413_s1 + $0x120] sm:$0xff]   ;;  %v4229_v25 = vld [vmem:[%s5413_s1 + $0x128] sm:$0xff]   ;;  %v4557_v27 = vld [vmem:[%s4443_s10 + $0x10] sm:$0xff]  }
  0x1d   : > { %3456 = vmatprep.subr.bf16.mxu0 %v4197_v13  ;;  %4004 = vmatprep.subr.bf16.mxu1 %v4407_v14  ;;  %v371_v59 = vor.u32 %v369_v48, %v368_v54  ;;  %v877_v61 = vor.u32 %v876_v57, %v872_v52  ;;  %v373_v13 = vshrl.u32 %v4225_v6, 16  ;;  %v4230_v29 = vld [vmem:[%s5413_s1 + $0xe8] sm:$0xff]   ;;  %v4235_v45 = vld [vmem:[%s5413_s1 + $0x130] sm:$0xff]   ;;  %v4237_v52 = vld [vmem:[%s5413_s1 + $0x138] sm:$0xff]  }
  0x1e   : > { %3888 = vmatprep.mubr.bf16.mxu1 %v4485_v39  ;;  %v4517_v60 = vsel %vm4465_vm2, %v870_v56, 0  ;;  %v4232_v31 = vld [vmem:[%s4443_s10 + $0x68] sm:$0xff]   ;;  %v4238_v54 = vld [vmem:[%s5413_s1 + $0xf8] sm:$0xff]  }
  0x1f   : > { %v4525_v63 = vsel %vm4503_vm4, %v371_v59, 0  ;;  %v893_v35 = vshrl.u32 %v4232_v31, 16  ;;  %v4240_v57 = vld [vmem:[%s4443_s10 + $0x18] sm:$0xff]   ;;  %v4297_v51 = vld [vmem:[%s5413_s1 + $0x208] sm:$0xff]  }
  0x20   : > { %3457 = vmatpush3.bf16.msra.mxu0 %v4199_v15  ;;  %4012 = vmatpush3.bf16.msra.mxu1 %v4407_v14  ;;  %v376_v15 = vshll.u32 %v4225_v6, 16  ;;  %v387_v59 = vshrl.u32 %v4240_v57, 16  ;;  %v4627_v6 = vld [vmem:[%s4443_s10 + $0x20] sm:$0xff]  }
  0x21   : > { %3458 = vmatprep.subr.bf16.mxu0 %v4200_v16  ;;  %4005 = vmatprep.subr.bf16.mxu1 %v4424_v17  ;;  %v886_v16 = vshrl.u32 %v4226_v10, 16 }
  0x24   : > { %3459 = vmatpush3.bf16.msra.mxu0 %v4202_v18  ;;  %4013 = vmatpush3.bf16.msra.mxu1 %v4424_v17  ;;  %v888_v18 = vshll.u32 %v4226_v10, 16  ;;  %v4245_v10 = vld [vmem:[%s4443_s10 + $0x28] sm:$0xff]  }
  0x25   : > { %3460 = vmatprep.subr.bf16.mxu0 %v4203_v19  ;;  %4006 = vmatprep.subr.bf16.mxu1 %v4438_v20  ;;  %v375_v19 = vrot.slane %v373_v13, 7 }
  0x26   : > { %v890_v24 = vrot.slane %v888_v18, 1  ;;  %v4248_v18 = vld [vmem:[%s4443_s10 + $0x30] sm:$0xff]  }
  0x27   : > { %v378_v26 = vor.u32 %v376_v15, %v375_v19  ;;  %v401_v15 = vshrl.u32 %v4245_v10, 16 }
  0x28   : > { %3461 = vmatpush3.bf16.msra.mxu0 %v4205_v21  ;;  %4014 = vmatpush3.bf16.msra.mxu1 %v4438_v20  ;;  %v4228_v21 = vld [vmem:[%s5413_s1 + $0xe0] sm:$0xff]  }
  0x29   : > { %3462 = vmatprep.subr.bf16.mxu0 %v4206_v22  ;;  %4007 = vmatprep.subr.bf16.mxu1 %v4454_v23  ;;  %v4571_v32 = vsel %vm4503_vm4, %v378_v26, 0  ;;  %v403_v19 = vrot.slane %v401_v15, 7 }
  0x2c   : > { %3463 = vmatpush3.bf16.msra.mxu0 %v4208_v28  ;;  %4015 = vmatpush3.bf16.msra.mxu1 %v4454_v23  ;;  %v891_v28 = vor.u32 %v890_v24, %v886_v16  ;;  %v404_v16 = vshll.u32 %v4245_v10, 16  ;;  %v4256_v24 = vld [vmem:[%s5413_s1 + $0x158] sm:$0xff]  }
  0x2d   : > { %3584 = vmatprep.subr.bf16.mxu1 %v4211_v33  ;;  %3856 = vmatprep.subr.bf16.mxu0 %v4353_v1  ;;  %v4233_v33 = vld [vmem:[%s4443_s10 + $0x10] sm:$0xff]  }
  0x2e   : > { %v4578_v34 = vsel %vm4465_vm2, %v891_v28, 0  ;;  %v383_v40 = vshll.u32 %v4233_v33, 16  ;;  %v4666_v28 = vld [vmem:[%s4443_s10 + $0x30] sm:$0xff]  }
  0x2f   : > { %1252 = vmatmul.mubr.bf16.vlgmr.msra.gmra.mrb[0].mxu0 %v4313_v2  ;;  %3889 = vmatmul.mubr.bf16.vlgmr.msra.gmra.mrb[0].mxu1 %v4492_v43 }
  0x30   : > { %3585 = vmatpush3.bf16.msra.mxu1 %v4212_v36  ;;  %1259 = vmatprep.mubr.bf16.mxu0 %v4480_v38  ;;  %v895_v36 = vshll.u32 %v4232_v31, 16  ;;  %v411_v31 = vshll.u32 %v4248_v18, 16 }
  0x31   : > { %3586 = vmatprep.subr.bf16.mxu1 %v4213_v37  ;;  %3857 = vmatpush3.bf16.msra.mxu0 %v4353_v1  ;;  %v4532_v1 = vsel %vm4465_vm2, %v877_v61, 0  ;;  %v4234_v37 = vld [vmem:[%s4443_s10 + $0x70] sm:$0xff]   ;;  %v390_v61 = vshll.u32 %v4240_v57, 16 }
  0x32   : > { %3858 = vmatprep.subr.bf16.mxu0 %v4367_v5  ;;  %3892 = vmatprep.mubr.bf16.mxu1 %v4517_v60  ;;  %v897_v41 = vrot.slane %v895_v36, 1  ;;  %v900_v42 = vshrl.u32 %v4234_v37, 16  ;;  %v902_v44 = vshll.u32 %v4234_v37, 16 }
  0x34   : > { %3587 = vmatpush3.bf16.msra.mxu1 %v4214_v49  ;;  %v898_v47 = vor.u32 %v897_v41, %v893_v35  ;;  %v904_v48 = vrot.slane %v902_v44, 1  ;;  %v4236_v49 = vld [vmem:[%s5413_s1 + $0xf0] sm:$0xff]   ;;  %v4261_v35 = vld [vmem:[%s5413_s1 + $0x160] sm:$0xff]   ;;  %v4266_v41 = vld [vmem:[%s5413_s1 + $0x168] sm:$0xff]  }
  0x35   : > { %3588 = vmatprep.subr.bf16.mxu1 %v4219_v55  ;;  %3859 = vmatpush3.bf16.msra.mxu0 %v4367_v5  ;;  %v883_v5 = vrot.slane %v881_v9, 1  ;;  %v4602_v55 = vld [vmem:[%s4443_s10 + $0x18] sm:$0xff]  }
  0x36   : > { %3860 = vmatprep.subr.bf16.mxu0 %v4379_v8  ;;  %v905_v53 = vor.u32 %v904_v48, %v900_v42  ;;  %v4684_v44 = vld [vmem:[%s4443_s10 + $0x38] sm:$0xff]   ;;  %v4694_v48 = vld [vmem:[%s4443_s10 + $0x40] sm:$0xff]  }
  0x37   : > { %1260 = vmatmul.mubr.bf16.gmra.mrb[4].mxu0 %v4525_v63  ;;  %3893 = vmatmul.mubr.bf16.gmra.mrb[4].mxu1 %v4532_v1  ;;  %v884_v22 = vor.u32 %v883_v5, %v879_v7  ;;  %v4643_v5 = vld [vmem:[%s4443_s10 + $0x28] sm:$0xff]  }
  0x38   : > { %3589 = vmatpush3.bf16.msra.mxu1 %v4220_v58  ;;  %1267 = vmatprep.mubr.bf16.mxu0 %v4528_v0  ;;  %v4615_v58 = vsel %vm4465_vm2, %v905_v53, 0 }
  0x39   : > { %3590 = vmatprep.subr.bf16.mxu1 %v4221_v62  ;;  %3861 = vmatpush3.bf16.msra.mxu0 %v4379_v8  ;;  %v4561_v8 = vsel %vm4465_vm2, %v884_v22, 0  ;;  %v389_v62 = vrot.slane %v387_v59, 7  ;;  %v408_v22 = vshrl.u32 %v4248_v18, 16  ;;  %v4709_v59 = vld [vmem:[%s4443_s10 + $0x48] sm:$0xff]  }
  0x3a   : > { %3862 = vmatprep.subr.bf16.mxu0 %v4392_v11  ;;  %3896 = vmatprep.mubr.bf16.mxu1 %v4561_v8 }
  0x3b   : > { %v392_v4 = vor.u32 %v390_v61, %v389_v62 }
  0x3c   : > { %3591 = vmatpush3.bf16.msra.mxu1 %v4222_v3  ;;  %v4243_v3 = vld [vmem:[%s4443_s10 + $0x20] sm:$0xff]  }
  0x3d   : > { %3592 = vmatprep.subr.bf16.mxu1 %v4227_v12  ;;  %3863 = vmatpush3.bf16.msra.mxu0 %v4392_v11  ;;  %v380_v11 = vshrl.u32 %v4233_v33, 16  ;;  %v394_v7 = vshrl.u32 %v4243_v3, 16  ;;  %v397_v9 = vshll.u32 %v4243_v3, 16  ;;  %v4632_v12 = vsel %vm4503_vm4, %v392_v4, 0  ;;  %v4258_v4 = vld [vmem:[%s4443_s10 + $0x50] sm:$0xff]  }
  0x3e   : > { %3864 = vmatprep.subr.bf16.mxu0 %v4407_v14  ;;  %v436_v10 = vshrl.u32 %v4258_v4, 16 }
  0x3f   : > { %1268 = vmatmul.mubr.bf16.gmra.mrb[8].mxu0 %v4571_v32  ;;  %3897 = vmatmul.mubr.bf16.gmra.mrb[8].mxu1 %v4578_v34  ;;  %v382_v46 = vrot.slane %v380_v11, 7  ;;  %v4253_v11 = vld [vmem:[%s4443_s10 + $0x40] sm:$0xff]  }
  0x40   : > { %3593 = vmatpush3.bf16.msra.mxu1 %v4228_v21  ;;  %1275 = vmatprep.mubr.bf16.mxu0 %v4557_v27  ;;  %v406_v21 = vor.u32 %v404_v16, %v403_v19  ;;  %v438_v16 = vrot.slane %v436_v10, 7  ;;  %v4736_v19 = vld [vmem:[%s4443_s10 + $0x58] sm:$0xff]  }
  0x41   : > { %3594 = vmatprep.subr.bf16.mxu1 %v4229_v25  ;;  %3865 = vmatpush3.bf16.msra.mxu0 %v4407_v14  ;;  %v385_v50 = vor.u32 %v383_v40, %v382_v46  ;;  %v4596_v14 = vsel %vm4465_vm2, %v898_v47, 0  ;;  %v4250_v25 = vld [vmem:[%s4443_s10 + $0x38] sm:$0xff]   ;;  %v422_v46 = vshrl.u32 %v4253_v11, 16  ;;  %v4270_v47 = vld [vmem:[%s5413_s1 + $0x170] sm:$0xff]  }
  0x42   : > { %3866 = vmatprep.subr.bf16.mxu0 %v4424_v17  ;;  %3900 = vmatprep.mubr.bf16.mxu1 %v4596_v14  ;;  %v4663_v26 = vsel %vm4503_vm4, %v406_v21, 0  ;;  %v415_v33 = vshrl.u32 %v4250_v25, 16  ;;  %v418_v37 = vshll.u32 %v4250_v25, 16 }
  0x43   : > { %v4608_v56 = vsel %vm4503_vm4, %v385_v50, 0  ;;  %v4255_v50 = vld [vmem:[%s4443_s10 + $0x48] sm:$0xff]  }
  0x44   : > { %3595 = vmatpush3.bf16.msra.mxu1 %v4230_v29  ;;  %v410_v29 = vrot.slane %v408_v22, 7  ;;  %v417_v40 = vrot.slane %v415_v33, 7  ;;  %v429_v57 = vshrl.u32 %v4255_v50, 16  ;;  %v432_v62 = vshll.u32 %v4255_v50, 16 }
  0x45   : > { %3596 = vmatprep.subr.bf16.mxu1 %v4235_v45  ;;  %3867 = vmatpush3.bf16.msra.mxu0 %v4424_v17  ;;  %v4241_v17 = vld [vmem:[%s5413_s1 + $0x140] sm:$0xff]  }
  0x46   : > { %3868 = vmatprep.subr.bf16.mxu0 %v4438_v20  ;;  %v413_v36 = vor.u32 %v411_v31, %v410_v29  ;;  %v420_v45 = vor.u32 %v418_v37, %v417_v40  ;;  %v431_v61 = vrot.slane %v429_v57, 7  ;;  %v4746_v29 = vld [vmem:[%s5413_s1 + $0x200] sm:$0xff]   ;;  %v4265_v37 = vld [vmem:[%s4443_s10 + $0x68] sm:$0xff]  }
  0x47   : > { %1276 = vmatmul.mubr.bf16.gmra.mrb[12].mxu0 %v4608_v56  ;;  %3901 = vmatmul.mubr.bf16.gmra.mrb[12].mxu1 %v4615_v58  ;;  %v460_v50 = vshll.u32 %v4265_v37, 16 }
  0x48   : > { %3597 = vmatpush3.bf16.msra.mxu1 %v4236_v49  ;;  %1283 = vmatprep.mubr.bf16.mxu0 %v4602_v55  ;;  %v4681_v42 = vsel %vm4503_vm4, %v413_v36, 0  ;;  %v425_v49 = vshll.u32 %v4253_v11, 16  ;;  %v4702_v53 = vsel %vm4503_vm4, %v420_v45, 0  ;;  %v457_v45 = vshrl.u32 %v4265_v37, 16 }
  0x49   : > { %3598 = vmatprep.subr.bf16.mxu1 %v4237_v52  ;;  %1846 = vmatprep.mubr.bf16.mxu1 %v4480_v38  ;;  %v396_v38 = vrot.slane %v394_v7, 7  ;;  %v4271_v52 = vld [vmem:[%s5413_s1 + $0x1c0] sm:$0xff]   ;;  %v4283_v7 = vld [vmem:[%s5413_s1 + $0x178] sm:$0xff]  }
  0x4a   : > { %3869 = vmatpush3.bf16.msra.mxu0 %v4438_v20  ;;  %v4246_v20 = vld [vmem:[%s5413_s1 + $0x148] sm:$0xff]  }
  0x4b   : > { %3870 = vmatprep.subr.bf16.mxu0 %v4454_v23  ;;  %v399_v13 = vor.u32 %v397_v9, %v396_v38  ;;  %v434_v9 = vor.u32 %v432_v62, %v431_v61  ;;  %v4260_v38 = vld [vmem:[%s4443_s10 + $0x58] sm:$0xff]   ;;  %v4782_v61 = vld [vmem:[%s4443_s10 + $0x70] sm:$0xff]  }
  0x4c   : > { %3599 = vmatpush3.bf16.msra.mxu1 %v4238_v54  ;;  %v424_v54 = vrot.slane %v422_v46, 7  ;;  %v443_v18 = vshrl.u32 %v4260_v38, 16  ;;  %v446_v21 = vshll.u32 %v4260_v38, 16 }
  0x4d   : > { %3904 = vmatprep.subr.bf16.mxu1 %v4241_v17  ;;  %v4729_v15 = vsel %vm4503_vm4, %v434_v9, 0  ;;  %v4275_v9 = vld [vmem:[%s4443_s10 + $0x8] sm:$0xff]  }
  0x4e   : > { %3871 = vmatpush3.bf16.msra.mxu0 %v4454_v23  ;;  %v4251_v23 = vld [vmem:[%s5413_s1 + $0x150] sm:$0xff]   ;;  %v445_v22 = vrot.slane %v443_v18, 7 }
  0x4f   : > { %1284 = vmatmul.mubr.bf16.gmra.mrb[16].mxu0 %v4632_v12  ;;  %1847 = vmatmul.mubr.bf16.vlgmr.msra.gmra.mrb[16].mxu1 %v4525_v63  ;;  %v4651_v63 = vsel %vm4503_vm4, %v399_v13, 0  ;;  %v439_v13 = vshll.u32 %v4258_v4, 16 }
  0x50   : > { %1291 = vmatprep.mubr.bf16.mxu0 %v4627_v6  ;;  %3905 = vmatpush3.bf16.msra.mxu1 %v4241_v17  ;;  %v427_v17 = vor.u32 %v425_v49, %v424_v54  ;;  %v448_v31 = vor.u32 %v446_v21, %v445_v22  ;;  %v459_v49 = vrot.slane %v457_v45, 7  ;;  %v4276_v21 = vld [vmem:[%s4443_s10 + $0x10] sm:$0xff]   ;;  %v809_v22 = vshrl.u32 %v4275_v9, 16  ;;  %v4272_v45 = vld [vmem:[%s5413_s1 + $0x180] sm:$0xff]  }
  0x51   : > { %1854 = vmatprep.mubr.bf16.mxu1 %v4528_v0  ;;  %3906 = vmatprep.subr.bf16.mxu1 %v4246_v20 }
  0x52   : > { %3720 = vmatprep.subr.bf16.mxu0 %v4271_v52  ;;  %v4713_v3 = vsel %vm4503_vm4, %v427_v17, 0  ;;  %v4759_v11 = vsel %vm4503_vm4, %v448_v31, 0  ;;  %v4268_v52 = vld [vmem:[%s4443_s10 + $0x70] sm:$0xff]   ;;  %v462_v54 = vor.u32 %v460_v50, %v459_v49  ;;  %v4281_v31 = vld [vmem:[%s4443_s10 + $0x18] sm:$0xff]   ;;  %v816_v49 = vshrl.u32 %v4276_v21, 16 }
  0x53   : > { %v464_v57 = vshrl.u32 %v4268_v52, 16  ;;  %v467_v4 = vshll.u32 %v4268_v52, 16  ;;  %v4282_v52 = vld [vmem:[%s4443_s10 + $0x20] sm:$0xff]  }
  0x54   : > { %3907 = vmatpush3.bf16.msra.mxu1 %v4246_v20  ;;  %v4725_v20 = vld [vmem:[%s4443_s10 + $0x50] sm:$0xff]   ;;  %v4779_v17 = vsel %vm4503_vm4, %v462_v54, 0  ;;  %v4273_v54 = vld [vmem:[%s5413_s1 + $0x1c8] sm:$0xff]  }
  0x55   : > { %3908 = vmatprep.subr.bf16.mxu1 %v4251_v23  ;;  %v466_v62 = vrot.slane %v464_v57, 7 }
  0x57   : > { %1292 = vmatmul.mubr.bf16.gmra.mrb[20].mxu0 %v4651_v63  ;;  %1855 = vmatmul.mubr.bf16.gmra.mrb[20].mxu1 %v4571_v32  ;;  %v469_v10 = vor.u32 %v467_v4, %v466_v62  ;;  %v823_v62 = vshrl.u32 %v4281_v31, 16 }
  0x58   : > { %1299 = vmatprep.mubr.bf16.mxu0 %v4643_v5  ;;  %1862 = vmatprep.mubr.bf16.mxu1 %v4557_v27 }
  0x59   : > { %3909 = vmatpush3.bf16.msra.mxu1 %v4251_v23  ;;  %v441_v23 = vor.u32 %v439_v13, %v438_v16  ;;  %v811_v13 = vshll.u32 %v4275_v9, 16  ;;  %v4792_v16 = vsel %vm4503_vm4, %v469_v10, 0  ;;  %v4274_v9 = vld [vmem:[%s5413_s1 + $0x188] sm:$0xff]  }
  0x5a   : > { %3910 = vmatprep.subr.bf16.mxu1 %v4256_v24 }
  0x5b   : > { %v4741_v25 = vsel %vm4503_vm4, %v441_v23, 0 }
  0x5d   : > { %3911 = vmatpush3.bf16.msra.mxu1 %v4256_v24  ;;  %v4263_v24 = vld [vmem:[%s4443_s10 + $0x60] sm:$0xff]  }
  0x5e   : > { %3912 = vmatprep.subr.bf16.mxu1 %v4261_v35  ;;  %v450_v33 = vshrl.u32 %v4263_v24, 16  ;;  %v453_v36 = vshll.u32 %v4263_v24, 16  ;;  %v813_v24 = vrot.slane %v811_v13, 1  ;;  %v4277_v13 = vld [vmem:[%s5413_s1 + $0x1d0] sm:$0xff]  }
  0x5f   : > { %1300 = vmatmul.mubr.bf16.gmra.mrb[24].mxu0 %v4663_v26  ;;  %1863 = vmatmul.mubr.bf16.gmra.mrb[24].mxu1 %v4608_v56 }
  0x60   : > { %1307 = vmatprep.mubr.bf16.mxu0 %v4666_v28  ;;  %1870 = vmatprep.mubr.bf16.mxu1 %v4602_v55  ;;  %v452_v40 = vrot.slane %v450_v33, 7  ;;  %v814_v37 = vor.u32 %v813_v24, %v809_v22  ;;  %v4278_v22 = vld [vmem:[%s5413_s1 + $0x190] sm:$0xff]   ;;  %v830_v24 = vshrl.u32 %v4282_v52, 16 }
  0x61   : > { %3913 = vmatpush3.bf16.msra.mxu1 %v4261_v35  ;;  %v4754_v35 = vld [vmem:[%s4443_s10 + $0x60] sm:$0xff]  }
  0x62   : > { %3914 = vmatprep.subr.bf16.mxu1 %v4266_v41  ;;  %v4813_v57 = vsel %vm4465_vm2, %v814_v37, 0  ;;  %v4291_v37 = vld [vmem:[%s4443_s10 + $0x78] sm:$0xff]  }
  0x65   : > { %3915 = vmatpush3.bf16.msra.mxu1 %v4266_v41  ;;  %v455_v41 = vor.u32 %v453_v36, %v452_v40  ;;  %v818_v36 = vshll.u32 %v4276_v21, 16  ;;  %v825_v40 = vshll.u32 %v4281_v31, 16 }
  0x66   : > { %3916 = vmatprep.subr.bf16.mxu1 %v4270_v47 }
  0x67   : > { %1308 = vmatmul.mubr.bf16.gmra.mrb[28].mxu0 %v4681_v42  ;;  %1871 = vmatmul.mubr.bf16.gmra.mrb[28].mxu1 %v4632_v12  ;;  %v4767_v46 = vsel %vm4503_vm4, %v455_v41, 0  ;;  %v820_v50 = vrot.slane %v818_v36, 1  ;;  %v827_v4 = vrot.slane %v825_v40, 1  ;;  %v4279_v36 = vld [vmem:[%s5413_s1 + $0x1d8] sm:$0xff]  }
  0x68   : > { %1315 = vmatprep.mubr.bf16.mxu0 %v4684_v44  ;;  %1878 = vmatprep.mubr.bf16.mxu1 %v4627_v6 }
  0x69   : > { %3917 = vmatpush3.bf16.msra.mxu1 %v4270_v47  ;;  %v4770_v47 = vld [vmem:[%s4443_s10 + $0x68] sm:$0xff]   ;;  %v821_v10 = vor.u32 %v820_v50, %v816_v49  ;;  %v4280_v50 = vld [vmem:[%s5413_s1 + $0x198] sm:$0xff]  }
  0x6a   : > { %3918 = vmatprep.subr.bf16.mxu1 %v4283_v7 }
  0x6b   : > { %v4828_v21 = vsel %vm4465_vm2, %v821_v10, 0  ;;  %v4285_v10 = vld [vmem:[%s5413_s1 + $0x1a0] sm:$0xff]  }
  0x6d   : > { %3919 = vmatpush3.bf16.msra.mxu1 %v4283_v7  ;;  %v4269_v7 = vld [vmem:[%s4443_s10] sm:$0xff]  }
  0x6e   : > { %3952 = vmatprep.subr.bf16.mxu1 %v4746_v29  ;;  %v804_v38 = vshll.u32 %v4269_v7, 16  ;;  %v802_v18 = vshrl.u32 %v4269_v7, 16  ;;  %v4288_v7 = vld [vmem:[%s4443_s10 + $0x28] sm:$0xff]  }
  0x6f   : > { %1316 = vmatmul.mubr.bf16.gmra.mrb[32].mxu0 %v4702_v53  ;;  %1879 = vmatmul.mubr.bf16.gmra.mrb[32].mxu1 %v4651_v63 }
  0x70   : > { %1323 = vmatprep.mubr.bf16.mxu0 %v4694_v48  ;;  %1886 = vmatprep.mubr.bf16.mxu1 %v4643_v5  ;;  %v806_v23 = vrot.slane %v804_v38, 1  ;;  %v832_v38 = vshll.u32 %v4282_v52, 16 }
  0x72   : > { %v807_v33 = vor.u32 %v806_v23, %v802_v18  ;;  %v828_v18 = vor.u32 %v827_v4, %v823_v62  ;;  %v839_v23 = vshll.u32 %v4288_v7, 16  ;;  %v834_v31 = vrot.slane %v832_v38, 1  ;;  %v4284_v62 = vld [vmem:[%s5413_s1 + $0x1e0] sm:$0xff]  }
  0x73   : > { %v471_v4 = vshrl.u32 %v4291_v37, 16 }
  0x74   : > { %v4802_v41 = vsel %vm4465_vm2, %v807_v33, 0  ;;  %v4290_v33 = vld [vmem:[%s4443_s10 + $0x30] sm:$0xff]   ;;  %v4840_v40 = vsel %vm4465_vm2, %v828_v18, 0  ;;  %v841_v49 = vrot.slane %v839_v23, 1  ;;  %v835_v52 = vor.u32 %v834_v31, %v830_v24  ;;  %v4286_v18 = vld [vmem:[%s5413_s1 + $0x1e8] sm:$0xff]   ;;  %v4867_v31 = vld [vmem:[%s4443_s10 + $0x78] sm:$0xff]  }
  0x75   : > { %v844_v38 = vshrl.u32 %v4290_v33, 16  ;;  %v473_v23 = vrot.slane %v471_v4, 7 }
  0x77   : > { %1324 = vmatmul.mubr.bf16.gmra.mrb[36].mxu0 %v4713_v3  ;;  %1887 = vmatmul.mubr.bf16.gmra.mrb[36].mxu1 %v4663_v26 }
  0x78   : > { %1331 = vmatprep.mubr.bf16.mxu0 %v4709_v59  ;;  %1894 = vmatprep.mubr.bf16.mxu1 %v4666_v28 }
  0x7f   : > { %1332 = vmatmul.mubr.bf16.gmra.mrb[40].mxu0 %v4729_v15  ;;  %1895 = vmatmul.mubr.bf16.gmra.mrb[40].mxu1 %v4681_v42 }
  0x80   : > { %1339 = vmatprep.mubr.bf16.mxu0 %v4725_v20  ;;  %1902 = vmatprep.mubr.bf16.mxu1 %v4684_v44 }
  0x87   : > { %1340 = vmatmul.mubr.bf16.gmra.mrb[44].mxu0 %v4741_v25  ;;  %1903 = vmatmul.mubr.bf16.gmra.mrb[44].mxu1 %v4702_v53 }
  0x88   : > { %1347 = vmatprep.mubr.bf16.mxu0 %v4736_v19  ;;  %1910 = vmatprep.mubr.bf16.mxu1 %v4694_v48 }
  0x8f   : > { %1348 = vmatmul.mubr.bf16.gmra.mrb[48].mxu0 %v4759_v11  ;;  %1911 = vmatmul.mubr.bf16.gmra.mrb[48].mxu1 %v4713_v3 }
  0x90   : > { %1355 = vmatprep.mubr.bf16.mxu0 %v4754_v35  ;;  %1918 = vmatprep.mubr.bf16.mxu1 %v4709_v59 }
  0x97   : > { %1356 = vmatmul.mubr.bf16.gmra.mrb[52].mxu0 %v4767_v46  ;;  %1919 = vmatmul.mubr.bf16.gmra.mrb[52].mxu1 %v4729_v15 }
  0x98   : > { %1363 = vmatprep.mubr.bf16.mxu0 %v4770_v47  ;;  %1926 = vmatprep.mubr.bf16.mxu1 %v4725_v20 }
  0x9f   : > { %1364 = vmatmul.mubr.bf16.gmra.mrb[56].mxu0 %v4779_v17  ;;  %1927 = vmatmul.mubr.bf16.gmra.mrb[56].mxu1 %v4741_v25 }
  0xa0   : > { %1371 = vmatprep.mubr.bf16.mxu0 %v4782_v61  ;;  %1934 = vmatprep.mubr.bf16.mxu1 %v4736_v19 }
  0xa7   : > { %1372 = vmatmul.mubr.bf16.gmra.mrb[60].mxu0 %v4792_v16  ;;  %1935 = vmatmul.mubr.bf16.gmra.mrb[60].mxu1 %v4759_v11 }
  0xa8   : > { %3872 = vmatprep.mubr.bf16.mxu0 %v4313_v2  ;;  %1942 = vmatprep.mubr.bf16.mxu1 %v4754_v35 }
  0xaf   : > { %3873 = vmatmul.mubr.bf16.vlgmr.msra.gmra.mrb[64].mxu0 %v4802_v41  ;;  %1943 = vmatmul.mubr.bf16.gmra.mrb[64].mxu1 %v4767_v46 }
  0xb0   : > { %3721 = vmatpush3.bf16.msra.mxu0 %v4272_v45  ;;  %3876 = vmatprep.mubr.bf16.mxu0 %v4813_v57  ;;  %v837_v45 = vshrl.u32 %v4288_v7, 16 }
  0xb1   : > { %3722 = vmatprep.subr.bf16.mxu0 %v4273_v54  ;;  %1950 = vmatprep.mubr.bf16.mxu1 %v4770_v47  ;;  %v846_v54 = vshll.u32 %v4290_v33, 16  ;;  %v4287_v33 = vld [vmem:[%s5413_s1 + $0x1a8] sm:$0xff]  }
  0xb2   : > { %v842_v7 = vor.u32 %v841_v49, %v837_v45  ;;  %v4292_v45 = vld [vmem:[%s5413_s1 + $0x1f0] sm:$0xff]  }
  0xb4   : > { %3723 = vmatpush3.bf16.msra.mxu0 %v4274_v9  ;;  %v4854_v9 = vsel %vm4465_vm2, %v835_v52, 0  ;;  %v4864_v24 = vsel %vm4465_vm2, %v842_v7, 0 }
  0xb5   : > { %3724 = vmatprep.subr.bf16.mxu0 %v4277_v13  ;;  %v848_v13 = vrot.slane %v846_v54, 1  ;;  %v4294_v54 = vld [vmem:[%s5413_s1 + $0x1f8] sm:$0xff]  }
  0xb7   : > { %3877 = vmatmul.mubr.bf16.gmra.mrb[68].mxu0 %v4828_v21  ;;  %1951 = vmatmul.mubr.bf16.gmra.mrb[68].mxu1 %v4779_v17 }
  0xb8   : > { %3725 = vmatpush3.bf16.msra.mxu0 %v4278_v22  ;;  %3880 = vmatprep.mubr.bf16.mxu0 %v4840_v40  ;;  %v474_v22 = vshll.u32 %v4291_v37, 16 }
  0xb9   : > { %3726 = vmatprep.subr.bf16.mxu0 %v4279_v36  ;;  %1958 = vmatprep.mubr.bf16.mxu1 %v4782_v61  ;;  %v849_v36 = vor.u32 %v848_v13, %v844_v38 }
  0xba   : > { %v476_v37 = vor.u32 %v474_v22, %v473_v23 }
  0xbb   : > { %v4881_v49 = vsel %vm4465_vm2, %v849_v36, 0 }
  0xbc   : > { %3727 = vmatpush3.bf16.msra.mxu0 %v4280_v50  ;;  %v4293_v50 = vld [vmem:[%s5413_s1 + $0x1b0] sm:$0xff]   ;;  %v4888_v52 = vsel %vm4503_vm4, %v476_v37, 0 }
  0xbd   : > { %3728 = vmatprep.subr.bf16.mxu0 %v4284_v62  ;;  %v4295_v62 = vld [vmem:[%s5413_s1 + $0x1b8] sm:$0xff]  }
  0xbf   : > { %3881 = vmatmul.mubr.bf16.gmra.mrb[72].mxu0 %v4854_v9  ;;  %1959 = vmatmul.mubr.bf16.gmra.mrb[72].mxu1 %v4792_v16 }
  0xc0   : > { %3729 = vmatpush3.bf16.msra.mxu0 %v4285_v10  ;;  %3884 = vmatprep.mubr.bf16.mxu0 %v4864_v24 }
  0xc1   : > { %3730 = vmatprep.subr.bf16.mxu0 %v4286_v18  ;;  %1966 = vmatprep.mubr.bf16.mxu1 %v4867_v31 }
  0xc4   : > { %3731 = vmatpush3.bf16.msra.mxu0 %v4287_v33 }
  0xc5   : > { %3732 = vmatprep.subr.bf16.mxu0 %v4292_v45 }
  0xc7   : > { %3885 = vmatmul.mubr.bf16.gmra.mrb[76].mxu0 %v4881_v49  ;;  %1967 = vmatmul.mubr.bf16.gmra.mrb[76].mxu1 %v4888_v52 }
  0xc8   : > { %3733 = vmatpush3.bf16.msra.mxu0 %v4293_v50  ;;  %3920 = vmatprep.mubr.bf16.mxu1 %v4802_v41  ;;  %v4299_v41 = vld [vmem:[%s5413_s1 + $0x218] sm:$0xff]  }
  0xc9   : > { %3734 = vmatprep.subr.bf16.mxu0 %v4294_v54  ;;  %2506 = vmatprep.mubr.bf16.mxu0 %v4528_v0  ;;  %v4298_v0 = vld [vmem:[%s5413_s1 + $0x210] sm:$0xff]  }
  0xcc   : > { %3735 = vmatpush3.bf16.msra.mxu0 %v4295_v62 }
  0xcf   : > { %2507 = vmatmul.mubr.bf16.vlgmr.msra.gmra.mrb[80].mxu0 %v4571_v32  ;;  %3921 = vmatmul.mubr.bf16.vlgmr.msra.gmra.mrb[80].mxu1 %v4813_v57  ;;  %v4301_v32 = vld [vmem:[%s5413_s1 + $0x228] sm:$0xff]  }
  0xd0   : > { %2514 = vmatprep.mubr.bf16.mxu0 %v4557_v27  ;;  %3953 = vmatpush3.bf16.msra.mxu1 %v4746_v29  ;;  %v4300_v27 = vld [vmem:[%s5413_s1 + $0x220] sm:$0xff]  }
  0xd1   : > { %3924 = vmatprep.mubr.bf16.mxu1 %v4828_v21  ;;  %3954 = vmatprep.subr.bf16.mxu1 %v4297_v51 }
  0xd4   : > { %3955 = vmatpush3.bf16.msra.mxu1 %v4297_v51 }
  0xd5   : > { %3956 = vmatprep.subr.bf16.mxu1 %v4298_v0 }
  0xd7   : > { %2515 = vmatmul.mubr.bf16.gmra.mrb[84].mxu0 %v4608_v56  ;;  %3925 = vmatmul.mubr.bf16.gmra.mrb[84].mxu1 %v4840_v40  ;;  %v4304_v56 = vld [vmem:[%s5413_s1 + $0x238] sm:$0xff]  }
  0xd8   : > { %2522 = vmatprep.mubr.bf16.mxu0 %v4602_v55  ;;  %3928 = vmatprep.mubr.bf16.mxu1 %v4854_v9  ;;  %v4302_v55 = vld [vmem:[%s5413_s1 + $0x230] sm:$0xff]  }
  0xd9   : > { %3957 = vmatpush3.bf16.msra.mxu1 %v4298_v0 }
  0xda   : > { %3958 = vmatprep.subr.bf16.mxu1 %v4299_v41 }
  0xdd   : > { %3959 = vmatpush3.bf16.msra.mxu1 %v4299_v41 }
  0xde   : > { %3960 = vmatprep.subr.bf16.mxu1 %v4300_v27 }
  0xdf   : > { %2523 = vmatmul.mubr.bf16.gmra.mrb[88].mxu0 %v4632_v12  ;;  %3929 = vmatmul.mubr.bf16.gmra.mrb[88].mxu1 %v4864_v24 }
  0xe0   : > { %2530 = vmatprep.mubr.bf16.mxu0 %v4627_v6  ;;  %3932 = vmatprep.mubr.bf16.mxu1 %v4881_v49  ;;  %v4303_v6 = vld [vmem:[%s4443_s10 + $0x78] sm:$0xff]  }
  0xe1   : > { %3961 = vmatpush3.bf16.msra.mxu1 %v4300_v27  ;;  %v909_v12 = vshll.u32 %v4303_v6, 16 }
  0xe2   : > { %3962 = vmatprep.subr.bf16.mxu1 %v4301_v32 }
  0xe5   : > { %3963 = vmatpush3.bf16.msra.mxu1 %v4301_v32 }
  0xe6   : > { %3964 = vmatprep.subr.bf16.mxu1 %v4302_v55 }
  0xe7   : > { %2531 = vmatmul.mubr.bf16.gmra.mrb[92].mxu0 %v4651_v63  ;;  %3933 = vmatmul.mubr.bf16.gmra.mrb[92].mxu1 %v4485_v39  ;;  %v911_v63 = vrot.slane %v909_v12, 1 }
  0xe8   : > { %2538 = vmatprep.mubr.bf16.mxu0 %v4643_v5  ;;  %3936 = vmatprep.mubr.bf16.mxu1 %v4492_v43  ;;  %v907_v5 = vshrl.u32 %v4303_v6, 16 }
  0xe9   : > { %3965 = vmatpush3.bf16.msra.mxu1 %v4302_v55 }
  0xea   : > { %3966 = vmatprep.subr.bf16.mxu1 %v4304_v56 }
  0xed   : > { %3967 = vmatpush3.bf16.msra.mxu1 %v4304_v56 }
  0xef   : > { %2539 = vmatmul.mubr.bf16.gmra.mrb[96].mxu0 %v4663_v26  ;;  %3937 = vmatmul.mubr.bf16.gmra.mrb[0].mxu1 %v4517_v60  ;;  %v912_v26 = vor.u32 %v911_v63, %v907_v5 }
  0xf0   : > { %2546 = vmatprep.mubr.bf16.mxu0 %v4666_v28  ;;  %3940 = vmatprep.mubr.bf16.mxu1 %v4532_v1 }
  0xf1   : > { %v4955_v7 = vsel %vm4465_vm2, %v912_v26, 0 }
  0xf7   : > { %2547 = vmatmul.mubr.bf16.gmra.mrb[100].mxu0 %v4681_v42  ;;  %3941 = vmatmul.mubr.bf16.gmra.mrb[4].mxu1 %v4561_v8 }
  0xf8   : > { %2554 = vmatprep.mubr.bf16.mxu0 %v4684_v44  ;;  %3944 = vmatprep.mubr.bf16.mxu1 %v4578_v34 }
  0xff   : > { %2555 = vmatmul.mubr.bf16.gmra.mrb[104].mxu0 %v4702_v53  ;;  %3945 = vmatmul.mubr.bf16.gmra.mrb[8].mxu1 %v4596_v14 }
 0x100   : > { %2562 = vmatprep.mubr.bf16.mxu0 %v4694_v48  ;;  %3948 = vmatprep.mubr.bf16.mxu1 %v4615_v58 }
 0x102   : > { %v3464_v28 = vpop.f32.mrb[0].mxu0 }
 0x103   : > { %v3465_v42 = vpop.f32.mrb[1].mxu0 }
 0x104   : > { %v4951_v29 = vadd.f32 %v3465_v42, %v3464_v28  ;;  %v3467_v4 = vpop.f32.mrb[2].mxu0 }
 0x105   : > { %v3468_v44 = vpop.f32.mrb[3].mxu0 }
 0x106   : > { %v4957_v10 = vadd.f32 %v3468_v44, %v3467_v4 }
 0x107   : > { %2563 = vmatmul.mubr.bf16.gmra.mrb[108].mxu0 %v4713_v3  ;;  %3949 = vmatmul.mubr.bf16.gmra.mrb[12].mxu1 %v4955_v7 }
 0x108   : > { %2570 = vmatprep.mubr.bf16.mxu0 %v4709_v59  ;;  %3968 = vmatprep.mubr.bf16.mxu1 %v4813_v57 }
 0x10a   : > { %v3470_v48 = vpop.f32.mrb[4].mxu0 }
 0x10b   : > { %v3471_v53 = vpop.f32.mrb[5].mxu0 }
 0x10c   : > { %v4963_v38 = vadd.f32 %v3471_v53, %v3470_v48  ;;  %v3473_v13 = vpop.f32.mrb[6].mxu0 }
 0x10d   : > { %v3474_v18 = vpop.f32.mrb[7].mxu0 }
 0x10e   : > { %v4965_v23 = vadd.f32 %v3474_v18, %v3473_v13 }
 0x10f   : > { %2571 = vmatmul.mubr.bf16.gmra.mrb[112].mxu0 %v4729_v15  ;;  %3969 = vmatmul.mubr.bf16.vlgmr.msra.gmra.mrb[80].mxu1 %v4828_v21 }
 0x110   : > { %2578 = vmatprep.mubr.bf16.mxu0 %v4725_v20  ;;  %3972 = vmatprep.mubr.bf16.mxu1 %v4840_v40 }
 0x112   : > { %v3476_v30 = vpop.f32.mrb[8].mxu0 }
 0x113   : > { %v3477_v59 = vpop.f32.mrb[9].mxu0 }
 0x114   : > { %v4971_v3 = vadd.f32 %v3477_v59, %v3476_v30  ;;  %v3479_v57 = vpop.f32.mrb[10].mxu0 }
 0x115   : > { %v3480_v22 = vpop.f32.mrb[11].mxu0 }
 0x116   : > { %v4973_v33 = vadd.f32 %v3480_v22, %v3479_v57 }
 0x117   : > { %2579 = vmatmul.mubr.bf16.gmra.mrb[116].mxu0 %v4741_v25  ;;  %3973 = vmatmul.mubr.bf16.gmra.mrb[84].mxu1 %v4854_v9 }
 0x118   : > { %2586 = vmatprep.mubr.bf16.mxu0 %v4736_v19  ;;  %3976 = vmatprep.mubr.bf16.mxu1 %v4864_v24 }
 0x11a   : > { %v3482_v15 = vpop.f32.mrb[12].mxu0 }
 0x11b   : > { %v3483_v20 = vpop.f32.mrb[13].mxu0 }
 0x11c   : > { %v4979_v21 = vadd.f32 %v3483_v20, %v3482_v15  ;;  %v3485_v40 = vpop.f32.mrb[14].mxu0 }
 0x11d   : > { %v3486_v36 = vpop.f32.mrb[15].mxu0 }
 0x11e   : > { %v4981_v37 = vadd.f32 %v3486_v36, %v3485_v40 }
 0x11f   : > { %2587 = vmatmul.mubr.bf16.gmra.mrb[120].mxu0 %v4759_v11  ;;  %3977 = vmatmul.mubr.bf16.gmra.mrb[88].mxu1 %v4881_v49 }
 0x120   : > { %2594 = vmatprep.mubr.bf16.mxu0 %v4754_v35  ;;  %3980 = vmatprep.mubr.bf16.mxu1 %v4485_v39 }
 0x122   : > { %v3488_v25 = vpop.f32.mrb[16].mxu0  ;;  %v3600_v19 = vpop.f32.mrb[16].mxu1 }
 0x123   : > { %v3489_v9 = vpop.f32.mrb[17].mxu0  ;;  %v3601_v24 = vpop.f32.mrb[17].mxu1 }
 0x124   : > { %v4987_v45 = vadd.f32 %v3489_v9, %v3488_v25  ;;  %v3491_v50 = vpop.f32.mrb[18].mxu0  ;;  %v4989_v54 = vadd.f32 %v3601_v24, %v3600_v19  ;;  %v3603_v62 = vpop.f32.mrb[18].mxu1 }
 0x125   : > { %v3492_v51 = vpop.f32.mrb[19].mxu0  ;;  %v3604_v0 = vpop.f32.mrb[19].mxu1 }
 0x126   : > { %v4991_v41 = vadd.f32 %v3492_v51, %v3491_v50  ;;  %v4993_v11 = vadd.f32 %v3604_v0, %v3603_v62 }
 0x127   : > { %2595 = vmatmul.mubr.bf16.gmra.mrb[124].mxu0 %v4767_v46  ;;  %3981 = vmatmul.mubr.bf16.gmra.mrb[92].mxu1 %v4492_v43 }
 0x128   : > { %2602 = vmatprep.mubr.bf16.mxu0 %v4770_v47  ;;  %3984 = vmatprep.mubr.bf16.mxu1 %v4517_v60 }
 0x12a   : > { %v3494_v39 = vpop.f32.mrb[20].mxu0  ;;  %v3606_v35 = vpop.f32.mrb[20].mxu1 }
 0x12b   : > { %v3495_v49 = vpop.f32.mrb[21].mxu0  ;;  %v3607_v27 = vpop.f32.mrb[21].mxu1 }
 0x12c   : > { %v4999_v32 = vadd.f32 %v3495_v49, %v3494_v39  ;;  %v3497_v55 = vpop.f32.mrb[22].mxu0  ;;  %v5001_v56 = vadd.f32 %v3607_v27, %v3606_v35  ;;  %v3609_v6 = vpop.f32.mrb[22].mxu1 }
 0x12d   : > { %v3498_v12 = vpop.f32.mrb[23].mxu0  ;;  %v3610_v5 = vpop.f32.mrb[23].mxu1 }
 0x12e   : > { %v5003_v63 = vadd.f32 %v3498_v12, %v3497_v55  ;;  %v5005_v46 = vadd.f32 %v3610_v5, %v3609_v6 }
 0x12f   : > { %2603 = vmatmul.mubr.bf16.gmra.mrb[128].mxu0 %v4779_v17  ;;  %3985 = vmatmul.mubr.bf16.gmra.mrb[0].mxu1 %v4532_v1 }
 0x130   : > { %2610 = vmatprep.mubr.bf16.mxu0 %v4782_v61  ;;  %3988 = vmatprep.mubr.bf16.mxu1 %v4561_v8 }
 0x132   : > { %v3500_v43 = vpop.f32.mrb[24].mxu0  ;;  %v3612_v60 = vpop.f32.mrb[24].mxu1 }
 0x133   : > { %v3501_v47 = vpop.f32.mrb[25].mxu0  ;;  %v3613_v26 = vpop.f32.mrb[25].mxu1 }
 0x134   : > { %v5011_v28 = vadd.f32 %v3501_v47, %v3500_v43  ;;  %v3503_v42 = vpop.f32.mrb[26].mxu0  ;;  %v5013_v4 = vadd.f32 %v3613_v26, %v3612_v60  ;;  %v3615_v44 = vpop.f32.mrb[26].mxu1 }
 0x135   : > { %v3504_v48 = vpop.f32.mrb[27].mxu0  ;;  %v3616_v53 = vpop.f32.mrb[27].mxu1 }
 0x136   : > { %v5015_v13 = vadd.f32 %v3504_v48, %v3503_v42  ;;  %v5017_v17 = vadd.f32 %v3616_v53, %v3615_v44 }
 0x137   : > { %2611 = vmatmul.mubr.bf16.gmra.mrb[132].mxu0 %v4792_v16  ;;  %3989 = vmatmul.mubr.bf16.gmra.mrb[4].mxu1 %v4578_v34 }
 0x138   : > { %2618 = vmatprep.mubr.bf16.mxu0 %v4867_v31  ;;  %3992 = vmatprep.mubr.bf16.mxu1 %v4596_v14 }
 0x13a   : > { %v3506_v1 = vpop.f32.mrb[28].mxu0  ;;  %v3618_v8 = vpop.f32.mrb[28].mxu1 }
 0x13b   : > { %v3507_v61 = vpop.f32.mrb[29].mxu0  ;;  %v3619_v18 = vpop.f32.mrb[29].mxu1 }
 0x13c   : > { %v5023_v30 = vadd.f32 %v3507_v61, %v3506_v1  ;;  %v3509_v59 = vpop.f32.mrb[30].mxu0  ;;  %v5025_v57 = vadd.f32 %v3619_v18, %v3618_v8  ;;  %v3621_v22 = vpop.f32.mrb[30].mxu1 }
 0x13d   : > { %v3510_v15 = vpop.f32.mrb[31].mxu0  ;;  %v3622_v20 = vpop.f32.mrb[31].mxu1 }
 0x13e   : > { %v5027_v40 = vadd.f32 %v3510_v15, %v3509_v59  ;;  %v5029_v16 = vadd.f32 %v3622_v20, %v3621_v22 }
 0x13f   : > { %2619 = vmatmul.mubr.bf16.gmra.mrb[136].mxu0 %v4888_v52  ;;  %3993 = vmatmul.mubr.bf16.gmra.mrb[8].mxu1 %v4615_v58 }
 0x140   : > { %2626 = vmatprep.mubr.bf16.mxu0 %v4313_v2  ;;  %3996 = vmatprep.mubr.bf16.mxu1 %v4955_v7 }
 0x142   : > { %v3512_v34 = vpop.f32.mrb[32].mxu0  ;;  %v3624_v14 = vpop.f32.mrb[32].mxu1 }
 0x143   : > { %v3513_v31 = vpop.f32.mrb[33].mxu0  ;;  %v3625_v36 = vpop.f32.mrb[33].mxu1 }
 0x144   : > { %v3514_v25 = vadd.f32 %v3513_v31, %v3512_v34  ;;  %v3515_v19 = vpop.f32.mrb[34].mxu0  ;;  %v5035_v9 = vadd.f32 %v3625_v36, %v3624_v14  ;;  %v3627_v24 = vpop.f32.mrb[34].mxu1 }
 0x145   : > { %v3516_v50 = vpop.f32.mrb[35].mxu0  ;;  %v3628_v62 = vpop.f32.mrb[35].mxu1 }
 0x146   : > { %v3517_v51 = vadd.f32 %v3516_v50, %v3515_v19  ;;  %v5037_v0 = vadd.f32 %v3628_v62, %v3627_v24 }
 0x147   : > { %2627 = vmatmul.mubr.bf16.gmra.mrb[140].mxu0 %v4313_v2  ;;  %3997 = vmatmul.mubr.bf16.gmra.mrb[12].mxu1 %v4313_v2 }
 0x14a   : > { %v3518_v58 = vpop.f32.mrb[36].mxu0  ;;  %v3630_v52 = vpop.f32.mrb[36].mxu1 }
 0x14b   : > { %v3519_v7 = vpop.f32.mrb[37].mxu0  ;;  %v3631_v39 = vpop.f32.mrb[37].mxu1 }
 0x14c   : > { %v3520_v35 = vadd.f32 %v3519_v7, %v3518_v58  ;;  %v3521_v49 = vpop.f32.mrb[38].mxu0  ;;  %v5041_v27 = vadd.f32 %v3631_v39, %v3630_v52  ;;  %v3633_v55 = vpop.f32.mrb[38].mxu1 }
 0x14d   : > { %v3522_v6 = vpop.f32.mrb[39].mxu0  ;;  %v3634_v12 = vpop.f32.mrb[39].mxu1 }
 0x14e   : > { %v3523_v5 = vadd.f32 %v3522_v6, %v3521_v49  ;;  %v5043_v43 = vadd.f32 %v3634_v12, %v3633_v55 }
 0x152   : > { %v3524_v60 = vpop.f32.mrb[40].mxu0  ;;  %v3636_v47 = vpop.f32.mrb[40].mxu1 }
 0x153   : > { %v3525_v26 = vpop.f32.mrb[41].mxu0  ;;  %v3637_v42 = vpop.f32.mrb[41].mxu1 }
 0x154   : > { %v3526_v44 = vadd.f32 %v3525_v26, %v3524_v60  ;;  %v3527_v2 = vpop.f32.mrb[42].mxu0  ;;  %v5045_v48 = vadd.f32 %v3637_v42, %v3636_v47  ;;  %v3639_v53 = vpop.f32.mrb[42].mxu1 }
 0x155   : > { %v3528_v1 = vpop.f32.mrb[43].mxu0  ;;  %v3640_v8 = vpop.f32.mrb[43].mxu1 }
 0x156   : > { %v3529_v61 = vadd.f32 %v3528_v1, %v3527_v2  ;;  %v5047_v18 = vadd.f32 %v3640_v8, %v3639_v53 }
 0x15a   : > { %v3530_v59 = vpop.f32.mrb[44].mxu0  ;;  %v3642_v22 = vpop.f32.mrb[44].mxu1 }
 0x15b   : > { %v3531_v15 = vpop.f32.mrb[45].mxu0  ;;  %v3643_v20 = vpop.f32.mrb[45].mxu1 }
 0x15c   : > { %v3532_v34 = vadd.f32 %v3531_v15, %v3530_v59  ;;  %v3533_v14 = vpop.f32.mrb[46].mxu0  ;;  %v5049_v31 = vadd.f32 %v3643_v20, %v3642_v22  ;;  %v3645_v36 = vpop.f32.mrb[46].mxu1 }
 0x15d   : > { %v3534_v19 = vpop.f32.mrb[47].mxu0  ;;  %v3646_v24 = vpop.f32.mrb[47].mxu1 }
 0x15e   : > { %v3535_v50 = vadd.f32 %v3534_v19, %v3533_v14  ;;  %v5051_v62 = vadd.f32 %v3646_v24, %v3645_v36 }
 0x162   : > { %v3536_v58 = vpop.f32.mrb[48].mxu0  ;;  %v3648_v52 = vpop.f32.mrb[48].mxu1 }
 0x163   : > { %v3537_v7 = vpop.f32.mrb[49].mxu0  ;;  %v3649_v39 = vpop.f32.mrb[49].mxu1 }
 0x164   : > { %v5053_v49 = vadd.f32 %v3537_v7, %v3536_v58  ;;  %v3539_v55 = vpop.f32.mrb[50].mxu0  ;;  %v3650_v6 = vadd.f32 %v3649_v39, %v3648_v52  ;;  %v3651_v12 = vpop.f32.mrb[50].mxu1 }
 0x165   : > { %v3540_v60 = vpop.f32.mrb[51].mxu0  ;;  %v3652_v47 = vpop.f32.mrb[51].mxu1 }
 0x166   : > { %v5055_v26 = vadd.f32 %v3540_v60, %v3539_v55  ;;  %v5057_v42 = vadd.f32 %v3650_v6, %v3514_v25  ;;  %v3653_v2 = vadd.f32 %v3652_v47, %v3651_v12 }
 0x168   : > { %v5059_v53 = vadd.f32 %v3653_v2, %v3517_v51 }
 0x16a   : > { %v3542_v1 = vpop.f32.mrb[52].mxu0  ;;  %v3654_v8 = vpop.f32.mrb[52].mxu1 }
 0x16b   : > { %v3543_v59 = vpop.f32.mrb[53].mxu0  ;;  %v3655_v22 = vpop.f32.mrb[53].mxu1 }
 0x16c   : > { %v5061_v15 = vadd.f32 %v3543_v59, %v3542_v1  ;;  %v3545_v20 = vpop.f32.mrb[54].mxu0  ;;  %v3656_v14 = vadd.f32 %v3655_v22, %v3654_v8  ;;  %v3657_v36 = vpop.f32.mrb[54].mxu1 }
 0x16d   : > { %v3546_v19 = vpop.f32.mrb[55].mxu0  ;;  %v3658_v24 = vpop.f32.mrb[55].mxu1 }
 0x16e   : > { %v5063_v58 = vadd.f32 %v3546_v19, %v3545_v20  ;;  %v5065_v52 = vadd.f32 %v3656_v14, %v3520_v35  ;;  %v3659_v25 = vadd.f32 %v3658_v24, %v3657_v36 }
 0x170   : > { %v5067_v7 = vadd.f32 %v3659_v25, %v3523_v5 }
 0x172   : > { %5421 = vst [vmem:[#allocation4_spill] sm:$0xff] %v5067_v7  ;;  %v3548_v51 = vpop.f32.mrb[56].mxu0  ;;  %v3660_v39 = vpop.f32.mrb[56].mxu1 }
 0x173   : > { %v3549_v55 = vpop.f32.mrb[57].mxu0  ;;  %v3661_v6 = vpop.f32.mrb[57].mxu1 }
 0x174   : > { %v5069_v12 = vadd.f32 %v3549_v55, %v3548_v51  ;;  %v3551_v60 = vpop.f32.mrb[58].mxu0  ;;  %v3662_v47 = vadd.f32 %v3661_v6, %v3660_v39  ;;  %v3663_v2 = vpop.f32.mrb[58].mxu1 }
 0x175   : > { %v3552_v1 = vpop.f32.mrb[59].mxu0  ;;  %v3664_v8 = vpop.f32.mrb[59].mxu1 }
 0x176   : > { %v5071_v59 = vadd.f32 %v3552_v1, %v3551_v60  ;;  %v5073_v22 = vadd.f32 %v3662_v47, %v3526_v44  ;;  %v3665_v35 = vadd.f32 %v3664_v8, %v3663_v2 }
 0x178   : > { %v5075_v20 = vadd.f32 %v3665_v35, %v3529_v61 }
 0x17a   : > { %v3554_v5 = vpop.f32.mrb[60].mxu0  ;;  %v3666_v14 = vpop.f32.mrb[60].mxu1 }
 0x17b   : > { %v3555_v36 = vpop.f32.mrb[61].mxu0  ;;  %v3667_v19 = vpop.f32.mrb[61].mxu1 }
 0x17c   : > { %v5077_v24 = vadd.f32 %v3555_v36, %v3554_v5  ;;  %v3557_v25 = vpop.f32.mrb[62].mxu0  ;;  %v3668_v51 = vadd.f32 %v3667_v19, %v3666_v14  ;;  %v3669_v55 = vpop.f32.mrb[62].mxu1 }
 0x17d   : > { %v3558_v39 = vpop.f32.mrb[63].mxu0  ;;  %v3670_v6 = vpop.f32.mrb[63].mxu1 }
 0x17e   : > { %v5079_v7 = vadd.f32 %v3558_v39, %v3557_v25  ;;  %v5081_v60 = vadd.f32 %v3668_v51, %v3532_v34  ;;  %v3671_v44 = vadd.f32 %v3670_v6, %v3669_v55 }
 0x180   : > { %v5083_v47 = vadd.f32 %v3671_v44, %v3535_v50 }
 0x182   : > { %v3874_v61 = vpop.f32.mrb[64].mxu0  ;;  %v3672_v1 = vpop.f32.mrb[64].mxu1 }
 0x183   : > { %v1423_v2 = vadd.f32 %v3874_v61, %v4963_v38  ;;  %v1414_v8 = vpop.f32.mrb[65].mxu0  ;;  %v3673_v5 = vpop.f32.mrb[65].mxu1 }
 0x184   : > { %v1415_v35 = vadd.f32 %v4951_v29, %v1414_v8  ;;  %v3875_v36 = vpop.f32.mrb[66].mxu0  ;;  %v3674_v19 = vadd.f32 %v3673_v5, %v3672_v1  ;;  %v3675_v34 = vpop.f32.mrb[66].mxu1 }
 0x185   : > { %v5088_v14 = vadd.f32 %v5001_v56, %v1423_v2  ;;  %v1426_v25 = vadd.f32 %v3875_v36, %v4965_v23  ;;  %v1417_v51 = vpop.f32.mrb[67].mxu0  ;;  %v3676_v38 = vpop.f32.mrb[67].mxu1 }
 0x186   : > { %v5092_v50 = vadd.f32 %v4989_v54, %v1415_v35  ;;  %v1418_v55 = vadd.f32 %v4957_v10, %v1417_v51  ;;  %v5096_v39 = vadd.f32 %v3674_v19, %v5053_v49  ;;  %v3677_v6 = vadd.f32 %v3676_v38, %v3675_v34 }
 0x187   : > { %v5099_v29 = vadd.f32 %v5005_v46, %v1426_v25 }
 0x188   : > { %v5102_v56 = vadd.f32 %v4993_v11, %v1418_v55  ;;  %v5105_v23 = vadd.f32 %v3677_v6, %v5055_v26 }
 0x18a   : > { %v3878_v44 = vpop.f32.mrb[68].mxu0  ;;  %v3678_v61 = vpop.f32.mrb[68].mxu1 }
 0x18b   : > { %v1439_v54 = vadd.f32 %v3878_v44, %v4979_v21  ;;  %v1430_v2 = vpop.f32.mrb[69].mxu0  ;;  %v3679_v1 = vpop.f32.mrb[69].mxu1 }
 0x18c   : > { %v1431_v10 = vadd.f32 %v4971_v3, %v1430_v2  ;;  %v3879_v49 = vpop.f32.mrb[70].mxu0  ;;  %v3680_v46 = vadd.f32 %v3679_v1, %v3678_v61  ;;  %v3681_v11 = vpop.f32.mrb[70].mxu1 }
 0x18d   : > { %v5110_v8 = vadd.f32 %v5025_v57, %v1439_v54  ;;  %v1442_v35 = vadd.f32 %v3879_v49, %v4981_v37  ;;  %v1433_v5 = vpop.f32.mrb[71].mxu0  ;;  %v3682_v21 = vpop.f32.mrb[71].mxu1 }
 0x18e   : > { %v5114_v26 = vadd.f32 %v5013_v4, %v1431_v10  ;;  %v1434_v36 = vadd.f32 %v4973_v33, %v1433_v5  ;;  %v5118_v19 = vadd.f32 %v3680_v46, %v5061_v15  ;;  %v3683_v25 = vadd.f32 %v3682_v21, %v3681_v11 }
 0x18f   : > { %v5121_v3 = vadd.f32 %v5029_v16, %v1442_v35 }
 0x190   : > { %v5124_v57 = vadd.f32 %v5017_v17, %v1434_v36  ;;  %v5127_v37 = vadd.f32 %v3683_v25, %v5063_v58 }
 0x192   : > { %v3882_v34 = vpop.f32.mrb[72].mxu0  ;;  %v3684_v51 = vpop.f32.mrb[72].mxu1 }
 0x193   : > { %v1455_v4 = vadd.f32 %v3882_v34, %v4999_v32  ;;  %v1446_v55 = vpop.f32.mrb[73].mxu0  ;;  %v3685_v38 = vpop.f32.mrb[73].mxu1 }
 0x194   : > { %v1447_v33 = vadd.f32 %v4987_v45, %v1446_v55  ;;  %v3883_v15 = vpop.f32.mrb[74].mxu0  ;;  %v3686_v16 = vadd.f32 %v3685_v38, %v3684_v51  ;;  %v3687_v17 = vpop.f32.mrb[74].mxu1 }
 0x195   : > { %v5132_v6 = vadd.f32 %v5041_v27, %v1455_v4  ;;  %v1458_v44 = vadd.f32 %v3883_v15, %v5003_v63  ;;  %v1449_v54 = vpop.f32.mrb[75].mxu0  ;;  %v3688_v32 = vpop.f32.mrb[75].mxu1 }
 0x196   : > { %v5136_v58 = vadd.f32 %v5035_v9, %v1447_v33  ;;  %v1450_v61 = vadd.f32 %v4991_v41, %v1449_v54  ;;  %v5140_v2 = vadd.f32 %v3686_v16, %v5069_v12  ;;  %v3689_v10 = vadd.f32 %v3688_v32, %v3687_v17 }
 0x197   : > { %v5143_v45 = vadd.f32 %v5043_v43, %v1458_v44 }
 0x198   : > { %v4061_v27 = vadd.f32 %v5037_v0, %v1450_v61  ;;  %v5147_v1 = vadd.f32 %v3689_v10, %v5071_v59 }
 0x19a   : > { %v3886_v63 = vpop.f32.mrb[76].mxu0  ;;  %v3690_v9 = vpop.f32.mrb[76].mxu1 }
 0x19b   : > { %v1471_v49 = vadd.f32 %v3886_v63, %v5023_v30  ;;  %v1462_v46 = vpop.f32.mrb[77].mxu0  ;;  %v3691_v35 = vpop.f32.mrb[77].mxu1 }
 0x19c   : > { %v1463_v41 = vadd.f32 %v5011_v28, %v1462_v46  ;;  %v3887_v11 = vpop.f32.mrb[78].mxu0  ;;  %v3692_v43 = vadd.f32 %v3691_v35, %v3690_v9  ;;  %v3693_v36 = vpop.f32.mrb[78].mxu1 }
 0x19d   : > { %v5152_v12 = vadd.f32 %v5049_v31, %v1471_v49  ;;  %v1474_v5 = vadd.f32 %v3887_v11, %v5027_v40  ;;  %v1465_v0 = vpop.f32.mrb[79].mxu0  ;;  %v3694_v25 = vpop.f32.mrb[79].mxu1 }
 0x19e   : > { %v4069_v59 = vadd.f32 %v5045_v48, %v1463_v41  ;;  %v1466_v21 = vadd.f32 %v5015_v13, %v1465_v0  ;;  %v5158_v30 = vadd.f32 %v3692_v43, %v5077_v24  ;;  %v3695_v34 = vadd.f32 %v3694_v25, %v3693_v36 }
 0x19f   : > { %v5161_v28 = vadd.f32 %v5051_v62, %v1474_v5 }
 0x1a0   : > { %v4077_v31 = vadd.f32 %v5047_v18, %v1466_v21  ;;  %v5165_v4 = vadd.f32 %v3695_v34, %v5079_v7 }
 0x1a2   : > { %v3736_v40 = vpop.f32.mrb[80].mxu0 }
 0x1a3   : > { %v3737_v51 = vpop.f32.mrb[81].mxu0 }
 0x1a4   : > { %v3738_v55 = vadd.f32 %v3737_v51, %v3736_v40  ;;  %v3739_v33 = vpop.f32.mrb[82].mxu0 }
 0x1a5   : > { %v3740_v48 = vpop.f32.mrb[83].mxu0 }
 0x1a6   : > { %v3741_v38 = vadd.f32 %v3740_v48, %v3739_v33  ;;  %v5168_v13 = vadd.f32 %v5092_v50, %v3738_v55 }
 0x1a8   : > { %v5171_v24 = vadd.f32 %v5102_v56, %v3741_v38 }
 0x1aa   : > { %v3742_v62 = vpop.f32.mrb[84].mxu0 }
 0x1ab   : > { %v3743_v15 = vpop.f32.mrb[85].mxu0 }
 0x1ac   : > { %v3744_v16 = vadd.f32 %v3743_v15, %v3742_v62  ;;  %v3745_v44 = vpop.f32.mrb[86].mxu0 }
 0x1ad   : > { %v3746_v18 = vpop.f32.mrb[87].mxu0 }
 0x1ae   : > { %v3747_v17 = vadd.f32 %v3746_v18, %v3745_v44  ;;  %v4018_v7 = vadd.f32 %v5088_v14, %v3744_v16 }
 0x1b0   : > { %v4026_v54 = vadd.f32 %v5099_v29, %v3747_v17 }
 0x1b2   : > { %v3748_v61 = vpop.f32.mrb[88].mxu0 }
 0x1b3   : > { %v3749_v32 = vpop.f32.mrb[89].mxu0 }
 0x1b4   : > { %v3750_v10 = vadd.f32 %v3749_v32, %v3748_v61  ;;  %v3751_v63 = vpop.f32.mrb[90].mxu0 }
 0x1b5   : > { %v3752_v49 = vpop.f32.mrb[91].mxu0 }
 0x1b6   : > { %v3753_v50 = vadd.f32 %v3752_v49, %v3751_v63  ;;  %v5176_v9 = vadd.f32 %v5114_v26, %v3750_v10 }
 0x1b8   : > { %v5179_v56 = vadd.f32 %v5124_v57, %v3753_v50 }
 0x1ba   : > { %v3754_v46 = vpop.f32.mrb[92].mxu0 }
 0x1bb   : > { %v3755_v41 = vpop.f32.mrb[93].mxu0 }
 0x1bc   : > { %v3756_v35 = vadd.f32 %v3755_v41, %v3754_v46  ;;  %v3757_v11 = vpop.f32.mrb[94].mxu0 }
 0x1bd   : > { %v3758_v43 = vpop.f32.mrb[95].mxu0 }
 0x1be   : > { %v3759_v14 = vadd.f32 %v3758_v43, %v3757_v11  ;;  %v4034_v29 = vadd.f32 %v5110_v8, %v3756_v35 }
 0x1c0   : > { %v5183_v5 = vadd.f32 %v5121_v3, %v3759_v14 }
 0x1c2   : > { %v3760_v36 = vpop.f32.mrb[96].mxu0 }
 0x1c3   : > { %v3761_v0 = vpop.f32.mrb[97].mxu0 }
 0x1c4   : > { %v3762_v21 = vadd.f32 %v3761_v0, %v3760_v36  ;;  %v3763_v25 = vpop.f32.mrb[98].mxu0 }
 0x1c5   : > { %v3764_v26 = vpop.f32.mrb[99].mxu0 }
 0x1c6   : > { %v3765_v34 = vadd.f32 %v3764_v26, %v3763_v25  ;;  %v5186_v57 = vadd.f32 %v5136_v58, %v3762_v21 }
 0x1c8   : > { %v5188_v40 = vadd.f32 %v4061_v27, %v3765_v34  ;;  %v5215_v34 = vld [vmem:[%s5415_s3] ss:$0 sm:$0xff] }
 0x1ca   : > { %v3766_v51 = vpop.f32.mrb[100].mxu0 }
 0x1cb   : > { %v3767_v55 = vpop.f32.mrb[101].mxu0 }
 0x1cc   : > { %v3768_v33 = vadd.f32 %v3767_v55, %v3766_v51  ;;  %v3769_v48 = vpop.f32.mrb[102].mxu0 }
 0x1cd   : > { %v3770_v38 = vpop.f32.mrb[103].mxu0 }
 0x1ce   : > { %v3771_v8 = vadd.f32 %v3770_v38, %v3769_v48  ;;  %v5191_v3 = vadd.f32 %v5132_v6, %v3768_v33 }
 0x1d0   : > { %v5194_v62 = vadd.f32 %v5143_v45, %v3771_v8 }
 0x1d2   : > { %v3772_v15 = vpop.f32.mrb[104].mxu0 }
 0x1d3   : > { %v3773_v16 = vpop.f32.mrb[105].mxu0 }
 0x1d4   : > { %v3774_v44 = vadd.f32 %v3773_v16, %v3772_v15  ;;  %v3775_v18 = vpop.f32.mrb[106].mxu0 }
 0x1d5   : > { %v3776_v58 = vpop.f32.mrb[107].mxu0 }
 0x1d6   : > { %v3777_v17 = vadd.f32 %v3776_v58, %v3775_v18  ;;  %v5196_v27 = vadd.f32 %v4069_v59, %v3774_v44  ;;  %v5209_v59 = vld [vmem:[%s5414_s2] ss:$0 sm:$0xff] }
 0x1d8   : > { %v5198_v61 = vadd.f32 %v4077_v31, %v3777_v17 }
 0x1da   : > { %v3778_v32 = vpop.f32.mrb[108].mxu0 }
 0x1db   : > { %v3779_v10 = vpop.f32.mrb[109].mxu0 }
 0x1dc   : > { %v3780_v63 = vadd.f32 %v3779_v10, %v3778_v32  ;;  %v3781_v49 = vpop.f32.mrb[110].mxu0 }
 0x1dd   : > { %v3782_v50 = vpop.f32.mrb[111].mxu0 }
 0x1de   : > { %v3783_v6 = vadd.f32 %v3782_v50, %v3781_v49  ;;  %v5201_v46 = vadd.f32 %v5152_v12, %v3780_v63 }
 0x1e0   : > { %v5204_v45 = vadd.f32 %v5161_v28, %v3783_v6 }
 0x1e2   : > { %v3784_v41 = vpop.f32.mrb[112].mxu0  ;;  %v3970_v35 = vpop.f32.mrb[80].mxu1 }
 0x1e3   : > { %v3785_v11 = vpop.f32.mrb[113].mxu0  ;;  %v4019_v43 = vadd.f32 %v4018_v7, %v3970_v35  ;;  %v2669_v14 = vpop.f32.mrb[81].mxu1 }
 0x1e4   : > { %v3786_v31 = vadd.f32 %v3785_v11, %v3784_v41  ;;  %v3787_v36 = vpop.f32.mrb[114].mxu0  ;;  %v4023_v0 = vadd.f32 %v5168_v13, %v2669_v14  ;;  %v3971_v21 = vpop.f32.mrb[82].mxu1 }
 0x1e5   : > { %v3788_v12 = vpop.f32.mrb[115].mxu0  ;;  %v4027_v25 = vadd.f32 %v4026_v54, %v3971_v21  ;;  %v2672_v28 = vpop.f32.mrb[83].mxu1  ;;  %v2933_v33 = vmul.f32 %v4019_v43, %v5209_v59 }
 0x1e6   : > { %v3789_v26 = vadd.f32 %v3788_v12, %v3787_v36  ;;  %v5218_v7 = vadd.f32 %v5057_v42, %v3786_v31  ;;  %v2931_v51 = vmul.f32 %v4023_v0, %v5209_v59  ;;  %v4031_v55 = vadd.f32 %v5171_v24, %v2672_v28  ;;  %v5422_v31 = vld [vmem:[#allocation4_spill] sm:$0xff] }
 0x1e7   : > { %v2972_v24 = vadd.f32 %v5215_v34, %v2933_v33  ;;  %v2934_v32 = vmul.f32 %v4027_v25, %v5209_v59 }
 0x1e8   : > { %v5224_v13 = vadd.f32 %v5059_v53, %v3789_v26  ;;  %v2932_v54 = vmul.f32 %v4031_v55, %v5209_v59  ;;  %v2970_v48 = vadd.f32 %v5215_v34, %v2931_v51 }
 0x1e9   : > { %v3004_v43 = vmul.f32 0.01, %v2972_v24  ;;  %v2973_v0 = vadd.f32 %v5215_v34, %v2934_v32 }
 0x1ea   : > { %v3790_v38 = vpop.f32.mrb[116].mxu0  ;;  %v3974_v8 = vpop.f32.mrb[84].mxu1  ;;  %v3002_v16 = vmul.f32 0.01, %v2970_v48  ;;  %v2971_v42 = vadd.f32 %v5215_v34, %v2932_v54 }
 0x1eb   : > { %v3791_v15 = vpop.f32.mrb[117].mxu0  ;;  %v4035_v44 = vadd.f32 %v4034_v29, %v3974_v8  ;;  %v2685_v58 = vpop.f32.mrb[85].mxu1  ;;  %v3036_v28 = vmax.f32 %v2972_v24, %v3004_v43 }
 0x1ec   : > { %v3792_v18 = vadd.f32 %v3791_v15, %v3790_v38  ;;  %v3793_v17 = vpop.f32.mrb[118].mxu0  ;;  %v4039_v53 = vadd.f32 %v5176_v9, %v2685_v58  ;;  %v3975_v10 = vpop.f32.mrb[86].mxu1  ;;  %v3034_v49 = vmax.f32 %v2970_v48, %v3002_v16  ;;  %v3003_v50 = vmul.f32 0.01, %v2971_v42 }
 0x1ed   : > { %v3794_v63 = vpop.f32.mrb[119].mxu0  ;;  %v4043_v6 = vadd.f32 %v5183_v5, %v3975_v10  ;;  %v2688_v35 = vpop.f32.mrb[87].mxu1  ;;  %v3005_v48 = vmul.f32 0.01, %v2973_v0 }
 0x1ee   : > { %v3795_v41 = vadd.f32 %v3794_v63, %v3793_v17  ;;  %v4047_v11 = vadd.f32 %v5179_v56, %v2688_v35  ;;  %3066 = vxpose.xlu0.b32.start [1/16] %v3034_v49, 128  ;;  %v5235_v29 = vadd.f32 %v5065_v52, %v3792_v18  ;;  %v2935_v9 = vmul.f32 %v4039_v53, %v5209_v59 }
 0x1ef   : > { %v3035_v36 = vmax.f32 %v2971_v42, %v3003_v50  ;;  %v3037_v58 = vmax.f32 %v2973_v0, %v3005_v48  ;;  %v2938_v10 = vmul.f32 %v4043_v6, %v5209_v59 }
 0x1f0   : > { %v5238_v14 = vadd.f32 %v5422_v31, %v3795_v41  ;;  %v2936_v51 = vmul.f32 %v4047_v11, %v5209_v59  ;;  %v2974_v38 = vadd.f32 %v5215_v34, %v2935_v9 }
 0x1f2   : > { %v3796_v21 = vpop.f32.mrb[120].mxu0  ;;  %v3978_v12 = vpop.f32.mrb[88].mxu1  ;;  %3067 = vxpose.xlu0.b32.cont [2/16] %v3035_v36, 128  ;;  %v3006_v17 = vmul.f32 0.01, %v2974_v38  ;;  %v2975_v24 = vadd.f32 %v5215_v34, %v2936_v51 }
 0x1f3   : > { %v3797_v5 = vpop.f32.mrb[121].mxu0  ;;  %v5243_v25 = vadd.f32 %v5191_v3, %v3978_v12  ;;  %v2701_v26 = vpop.f32.mrb[89].mxu1  ;;  %v2977_v12 = vadd.f32 %v5215_v34, %v2938_v10 }
 0x1f4   : > { %v3798_v56 = vadd.f32 %v3797_v5, %v3796_v21  ;;  %v3799_v52 = vpop.f32.mrb[122].mxu0  ;;  %v4055_v55 = vadd.f32 %v5186_v57, %v2701_v26  ;;  %v3979_v33 = vpop.f32.mrb[90].mxu1  ;;  %v2937_v57 = vmul.f32 %v4035_v44, %v5209_v59  ;;  %v3038_v41 = vmax.f32 %v2974_v38, %v3006_v17 }
 0x1f5   : > { %v3800_v54 = vpop.f32.mrb[123].mxu0  ;;  %v4059_v8 = vadd.f32 %v5194_v62, %v3979_v33  ;;  %v2704_v16 = vpop.f32.mrb[91].mxu1  ;;  %v3007_v35 = vmul.f32 0.01, %v2975_v24  ;;  %v3009_v48 = vmul.f32 0.01, %v2977_v12  ;;  %v2941_v38 = vmul.f32 %v5243_v25, %v5209_v59 }
 0x1f6   : > { %v3801_v15 = vadd.f32 %v3800_v54, %v3799_v52  ;;  %v4063_v3 = vadd.f32 %v5188_v40, %v2704_v16  ;;  %3068 = vxpose.xlu0.b32.cont [3/16] %v3036_v28, 128  ;;  %v5251_v42 = vadd.f32 %v5073_v22, %v3798_v56  ;;  %v2976_v11 = vadd.f32 %v5215_v34, %v2937_v57 }
 0x1f7   : > { %v2939_v9 = vmul.f32 %v4055_v55, %v5209_v59  ;;  %v3039_v0 = vmax.f32 %v2975_v24, %v3007_v35 }
 0x1f8   : > { %v5254_v18 = vadd.f32 %v5075_v20, %v3801_v15  ;;  %v3008_v21 = vmul.f32 0.01, %v2976_v11 }
 0x1f9   : > { %v2978_v26 = vadd.f32 %v5215_v34, %v2939_v9 }
 0x1fa   : > { %v3802_v32 = vpop.f32.mrb[124].mxu0  ;;  %v3982_v53 = vpop.f32.mrb[92].mxu1  ;;  %3069 = vxpose.xlu0.b32.cont [4/16] %v3037_v58, 128  ;;  %v3040_v54 = vmax.f32 %v2976_v11, %v3008_v21 }
 0x1fb   : > { %v3803_v62 = vpop.f32.mrb[125].mxu0  ;;  %v5260_v40 = vadd.f32 %v5201_v46, %v3982_v53  ;;  %v2717_v63 = vpop.f32.mrb[93].mxu1  ;;  %v3010_v17 = vmul.f32 0.01, %v2978_v26  ;;  %v3041_v53 = vmax.f32 %v2977_v12, %v3009_v48 }
 0x1fc   : > { %v3804_v22 = vadd.f32 %v3803_v62, %v3802_v32  ;;  %v3805_v49 = vpop.f32.mrb[126].mxu0  ;;  %v5263_v20 = vadd.f32 %v5196_v27, %v2717_v63  ;;  %v3983_v44 = vpop.f32.mrb[94].mxu1 }
 0x1fd   : > { %v3806_v50 = vpop.f32.mrb[127].mxu0  ;;  %v5267_v43 = vadd.f32 %v5204_v45, %v3983_v44  ;;  %v2720_v6 = vpop.f32.mrb[95].mxu1  ;;  %v3042_v63 = vmax.f32 %v2978_v26, %v3010_v17 }
 0x1fe   : > { %v3807_v31 = vadd.f32 %v3806_v50, %v3805_v49  ;;  %v4093_v46 = vadd.f32 %v5081_v60, %v3804_v22  ;;  %v5272_v36 = vadd.f32 %v5198_v61, %v2720_v6  ;;  %3070 = vxpose.xlu0.b32.cont [5/16] %v3038_v41, 128  ;;  %v2940_v60 = vmul.f32 %v4063_v3, %v5209_v59 }
 0x200   : > { %v4099_v27 = vadd.f32 %v5083_v47, %v3807_v31  ;;  %v2979_v24 = vadd.f32 %v5215_v34, %v2940_v60 }
 0x202   : > { %v3808_v5 = vpop.f32.mrb[128].mxu0  ;;  %v3986_v56 = vpop.f32.mrb[0].mxu1  ;;  %3071 = vxpose.xlu0.b32.cont [6/16] %v3039_v0, 128  ;;  %v3011_v31 = vmul.f32 0.01, %v2979_v24 }
 0x203   : > { %v3809_v45 = vpop.f32.mrb[129].mxu0  ;;  %v4082_v52 = vadd.f32 %v5235_v29, %v3986_v56  ;;  %v2733_v61 = vpop.f32.mrb[1].mxu1  ;;  %v2942_v29 = vmul.f32 %v4059_v8, %v5209_v59  ;;  %v5297_v8 = vadd.f32 %v5215_v34, %v2941_v38 }
 0x204   : > { %v3810_v28 = vadd.f32 %v3809_v45, %v3808_v5  ;;  %v3811_v51 = vpop.f32.mrb[130].mxu0  ;;  %v4085_v55 = vadd.f32 %v5218_v7, %v2733_v61  ;;  %v3987_v47 = vpop.f32.mrb[2].mxu1  ;;  %v2944_v61 = vmul.f32 %v5272_v36, %v5209_v59 }
 0x205   : > { %v3812_v33 = vpop.f32.mrb[131].mxu0  ;;  %v4088_v15 = vadd.f32 %v5238_v14, %v3987_v47  ;;  %v2736_v57 = vpop.f32.mrb[3].mxu1  ;;  %v2949_v14 = vmul.f32 %v4082_v52, %v5209_v59  ;;  %v2943_v52 = vmul.f32 %v5263_v20, %v5209_v59  ;;  %v3043_v47 = vmax.f32 %v2979_v24, %v3011_v31 }
 0x206   : > { %v3813_v16 = vadd.f32 %v3812_v33, %v3811_v51  ;;  %v5284_v3 = vadd.f32 %v5096_v39, %v3810_v28  ;;  %v2947_v58 = vmul.f32 %v4085_v55, %v5209_v59  ;;  %v4091_v7 = vadd.f32 %v5224_v13, %v2736_v57  ;;  %3072 = vxpose.xlu0.b32.cont [7/16] %v3040_v54, 128 }
 0x207   : > { %v2950_v44 = vmul.f32 %v4088_v15, %v5209_v59  ;;  %v2988_v5 = vadd.f32 %v5215_v34, %v2949_v14 }
 0x208   : > { %v5291_v32 = vadd.f32 %v5105_v23, %v3813_v16  ;;  %v2948_v25 = vmul.f32 %v4091_v7, %v5209_v59  ;;  %v2986_v39 = vadd.f32 %v5215_v34, %v2947_v58  ;;  %v5301_v23 = vadd.f32 %v5215_v34, %v2942_v29 }
 0x209   : > { %v2989_v51 = vadd.f32 %v5215_v34, %v2950_v44  ;;  %v3020_v33 = vmul.f32 0.01, %v2988_v5  ;;  %v5325_v7 = vadd.f32 %v5215_v34, %v2944_v61 }
 0x20a   : > { %v3814_v62 = vpop.f32.mrb[132].mxu0  ;;  %v3990_v10 = vpop.f32.mrb[4].mxu1  ;;  %3073 = vxpose.xlu0.b32.cont [8/16] %v3041_v53, 128  ;;  %v3018_v22 = vmul.f32 0.01, %v2986_v39  ;;  %v2987_v49 = vadd.f32 %v5215_v34, %v2948_v25 }
 0x20b   : > { %v3815_v13 = vpop.f32.mrb[133].mxu0  ;;  %v4094_v50 = vadd.f32 %v4093_v46, %v3990_v10  ;;  %v2749_v35 = vpop.f32.mrb[5].mxu1  ;;  %v3012_v46 = vmul.f32 0.01, %v5297_v8  ;;  %v3021_v58 = vmul.f32 0.01, %v2989_v51  ;;  %v3052_v25 = vmax.f32 %v2988_v5, %v3020_v33 }
 0x20c   : > { %v3816_v41 = vadd.f32 %v3815_v13, %v3814_v62  ;;  %v3817_v11 = vpop.f32.mrb[134].mxu0  ;;  %v4097_v6 = vadd.f32 %v5251_v42, %v2749_v35  ;;  %v3991_v9 = vpop.f32.mrb[6].mxu1  ;;  %v3050_v21 = vmax.f32 %v2986_v39, %v3018_v22  ;;  %v3019_v12 = vmul.f32 0.01, %v2987_v49 }
 0x20d   : > { %v3818_v0 = vpop.f32.mrb[135].mxu0  ;;  %v5306_v56 = vadd.f32 %v4099_v27, %v3991_v9  ;;  %v2752_v26 = vpop.f32.mrb[7].mxu1  ;;  %v3013_v42 = vmul.f32 0.01, %v5301_v23  ;;  %v3044_v20 = vmax.f32 %v5297_v8, %v3012_v46  ;;  %v2953_v22 = vmul.f32 %v4094_v50, %v5209_v59 }
 0x20e   : > { %v3819_v45 = vadd.f32 %v3818_v0, %v3817_v11  ;;  %v4105_v60 = vadd.f32 %v5118_v19, %v3816_v41  ;;  %v4103_v28 = vadd.f32 %v5254_v18, %v2752_v26  ;;  %3098 = vxpose.xlu1.b32.start [1/16] %v3050_v21, 128  ;;  %3074 = vxpose.xlu0.b32.cont [9/16] %v3042_v63, 128  ;;  %v3015_v46 = vmul.f32 0.01, %v5325_v7 }
 0x20f   : > { %v2951_v19 = vmul.f32 %v4097_v6, %v5209_v59  ;;  %v3051_v55 = vmax.f32 %v2987_v49, %v3019_v12  ;;  %v2945_v18 = vmul.f32 %v5260_v40, %v5209_v59  ;;  %v3045_v36 = vmax.f32 %v5301_v23, %v3013_v42 }
 0x210   : > { %v4111_v27 = vadd.f32 %v5127_v37, %v3819_v45  ;;  %v2982_v37 = vadd.f32 %v5215_v34, %v2943_v52  ;;  %v2952_v17 = vmul.f32 %v4103_v28, %v5209_v59  ;;  %v3053_v44 = vmax.f32 %v2989_v51, %v3021_v58 }
 0x211   : > { %v2990_v53 = vadd.f32 %v5215_v34, %v2951_v19  ;;  %v2946_v9 = vmul.f32 %v5267_v43, %v5209_v59  ;;  %v2984_v21 = vadd.f32 %v5215_v34, %v2945_v18  ;;  %v2992_v52 = vadd.f32 %v5215_v34, %v2953_v22 }
 0x212   : > { %v3820_v54 = vpop.f32.mrb[136].mxu0  ;;  %v3994_v48 = vpop.f32.mrb[8].mxu1  ;;  %3099 = vxpose.xlu1.b32.cont [2/16] %v3051_v55, 128  ;;  %3075 = vxpose.xlu0.b32.cont [10/16] %v3043_v47, 128  ;;  %v2991_v50 = vadd.f32 %v5215_v34, %v2952_v17  ;;  %v2954_v28 = vmul.f32 %v5306_v56, %v5209_v59 }
 0x213   : > { %v3821_v38 = vpop.f32.mrb[137].mxu0  ;;  %v4106_v15 = vadd.f32 %v4105_v60, %v3994_v48  ;;  %v2765_v57 = vpop.f32.mrb[9].mxu1  ;;  %v2985_v18 = vadd.f32 %v5215_v34, %v2946_v9 }
 0x214   : > { %v3822_v16 = vadd.f32 %v3821_v38, %v3820_v54  ;;  %v3823_v29 = vpop.f32.mrb[138].mxu0  ;;  %v4109_v40 = vadd.f32 %v5284_v3, %v2765_v57  ;;  %v3995_v24 = vpop.f32.mrb[10].mxu1  ;;  %v3014_v3 = vmul.f32 0.01, %v2982_v37  ;;  %v3023_v51 = vmul.f32 0.01, %v2991_v50 }
 0x215   : > { %v3824_v14 = vpop.f32.mrb[139].mxu0  ;;  %v2957_v39 = vmul.f32 %v4106_v15, %v5209_v59  ;;  %v4112_v62 = vadd.f32 %v4111_v27, %v3995_v24  ;;  %v2768_v10 = vpop.f32.mrb[11].mxu1  ;;  %v3047_v38 = vmax.f32 %v5325_v7, %v3015_v46 }
 0x216   : > { %v3825_v8 = vadd.f32 %v3824_v14, %v3823_v29  ;;  %v4120_v13 = vadd.f32 %v5140_v2, %v3822_v16  ;;  %v2955_v63 = vmul.f32 %v4109_v40, %v5209_v59  ;;  %v4115_v49 = vadd.f32 %v5291_v32, %v2768_v10  ;;  %3100 = vxpose.xlu1.b32.cont [3/16] %v3052_v25, 128 }
 0x217   : > { %3076 = vxpose.xlu0.b32.cont [11/16] %v3044_v20, 128  ;;  %v2958_v23 = vmul.f32 %v4112_v62, %v5209_v59  ;;  %v5338_v35 = vadd.f32 %v5215_v34, %v2957_v39  ;;  %v3022_v2 = vmul.f32 0.01, %v2990_v53  ;;  %v3046_v60 = vmax.f32 %v2982_v37, %v3014_v3 }
 0x218   : > { %v4126_v41 = vadd.f32 %v5147_v1, %v3825_v8  ;;  %v2956_v11 = vmul.f32 %v4115_v49, %v5209_v59  ;;  %v2994_v31 = vadd.f32 %v5215_v34, %v2955_v63  ;;  %v3016_v20 = vmul.f32 0.01, %v2984_v21 }
 0x219   : > { %v5344_v32 = vadd.f32 %v5215_v34, %v2958_v23  ;;  %v3054_v27 = vmax.f32 %v2990_v53, %v3022_v2  ;;  %v3055_v15 = vmax.f32 %v2991_v50, %v3023_v51  ;;  %v3017_v14 = vmul.f32 0.01, %v2985_v18 }
 0x21a   : > { %v3826_v6 = vpop.f32.mrb[140].mxu0  ;;  %v3998_v0 = vpop.f32.mrb[12].mxu1  ;;  %3101 = vxpose.xlu1.b32.cont [4/16] %v3053_v44, 128  ;;  %v2995_v12 = vadd.f32 %v5215_v34, %v2956_v11  ;;  %v3048_v40 = vmax.f32 %v2984_v21, %v3016_v20  ;;  %v3026_v62 = vmul.f32 0.01, %v2994_v31  ;;  %v3028_v22 = vmul.f32 0.01, %v5338_v35 }
 0x21b   : > { %3077 = vxpose.xlu0.b32.cont [12/16] %v3045_v36, 128  ;;  %v3827_v1 = vpop.f32.mrb[141].mxu0  ;;  %v2781_v45 = vpop.f32.mrb[13].mxu1  ;;  %v3024_v36 = vmul.f32 0.01, %v2992_v52  ;;  %v3049_v39 = vmax.f32 %v2985_v18, %v3017_v14  ;;  %v3029_v63 = vmul.f32 0.01, %v5344_v32 }
 0x21c   : > { %v3828_v5 = vadd.f32 %v3827_v1, %v3826_v6  ;;  %v3829_v26 = vpop.f32.mrb[142].mxu0  ;;  %v4121_v43 = vadd.f32 %v4120_v13, %v2781_v45  ;;  %v3999_v42 = vpop.f32.mrb[14].mxu1  ;;  %v3058_v8 = vmax.f32 %v2994_v31, %v3026_v62  ;;  %v3027_v10 = vmul.f32 0.01, %v2995_v12 }
 0x21d   : > { %v3830_v61 = vpop.f32.mrb[143].mxu0  ;;  %v2784_v47 = vpop.f32.mrb[15].mxu1  ;;  %v3056_v7 = vmax.f32 %v2992_v52, %v3024_v36 }
 0x21e   : > { %v4117_v19 = vadd.f32 %v5158_v30, %v3828_v5  ;;  %v3831_v55 = vadd.f32 %v3830_v61, %v3829_v26  ;;  %v2959_v33 = vmul.f32 %v4121_v43, %v5209_v59  ;;  %v4127_v54 = vadd.f32 %v4126_v41, %v2784_v47  ;;  %3102 = vxpose.xlu1.b32.cont [5/16] %v3054_v27, 128 }
 0x21f   : > { %3078 = vxpose.xlu0.b32.cont [13/16] %v3046_v60, 128  ;;  %v2993_v30 = vadd.f32 %v5215_v34, %v2954_v28  ;;  %v3059_v13 = vmax.f32 %v2995_v12, %v3027_v10 }
 0x220   : > { %v4118_v48 = vadd.f32 %v4117_v19, %v3998_v0  ;;  %v4123_v56 = vadd.f32 %v5165_v4, %v3831_v55  ;;  %v2960_v37 = vmul.f32 %v4127_v54, %v5209_v59  ;;  %v2998_v16 = vadd.f32 %v5215_v34, %v2959_v33 }
 0x221   : > { %v3025_v24 = vmul.f32 0.01, %v2993_v30 }
 0x222   : > { %v4124_v57 = vadd.f32 %v4123_v56, %v3999_v42  ;;  %v2961_v29 = vmul.f32 %v4118_v48, %v5209_v59  ;;  %3103 = vxpose.xlu1.b32.cont [6/16] %v3055_v15, 128  ;;  %v2999_v58 = vadd.f32 %v5215_v34, %v2960_v37  ;;  %v3030_v49 = vmul.f32 0.01, %v2998_v16 }
 0x223   : > { %3079 = vxpose.xlu0.b32.cont [14/16] %v3047_v38, 128  ;;  %v3057_v53 = vmax.f32 %v2993_v30, %v3025_v24 }
 0x224   : > { %v3000_v17 = vadd.f32 %v5215_v34, %v2961_v29  ;;  %v2962_v4 = vmul.f32 %v4124_v57, %v5209_v59  ;;  %v3060_v59 = vmax.f32 %v5338_v35, %v3028_v22  ;;  %v3062_v3 = vmax.f32 %v2998_v16, %v3030_v49 }
 0x225   : > { %v3031_v23 = vmul.f32 0.01, %v2999_v58 }
 0x226   : > { %v3001_v25 = vadd.f32 %v5215_v34, %v2962_v4  ;;  %3104 = vxpose.xlu1.b32.cont [7/16] %v3056_v7, 128  ;;  %v3061_v34 = vmax.f32 %v5344_v32, %v3029_v63  ;;  %v3032_v41 = vmul.f32 0.01, %v3000_v17 }
 0x227   : > { %3080 = vxpose.xlu0.b32.cont [15/16] %v3048_v40, 128  ;;  %v3063_v44 = vmax.f32 %v2999_v58, %v3031_v23 }
 0x228   : > { %v3064_v11 = vmax.f32 %v3000_v17, %v3032_v41  ;;  %v3033_v2 = vmul.f32 0.01, %v3001_v25 }
 0x22a   : > { %3105 = vxpose.xlu1.b32.cont [8/16] %v3057_v53, 128  ;;  %v3065_v50 = vmax.f32 %v3001_v25, %v3033_v2 }
 0x22b   : > { %3081 = vxpose.xlu0.b32.end [16/16] %v3049_v39, 128 }
 0x22e   : > { %3106 = vxpose.xlu1.b32.cont [9/16] %v3058_v8, 128 }
 0x232   : > { %3107 = vxpose.xlu1.b32.cont [10/16] %v3059_v13, 128 }
 0x236   : > { %3108 = vxpose.xlu1.b32.cont [11/16] %v3060_v59, 128 }
 0x23a   : > { %3109 = vxpose.xlu1.b32.cont [12/16] %v3061_v34, 128 }
 0x23e   : > { %3110 = vxpose.xlu1.b32.cont [13/16] %v3062_v3, 128 }
 0x242   : > { %3111 = vxpose.xlu1.b32.cont [14/16] %v3063_v44, 128 }
 0x246   : > { %3112 = vxpose.xlu1.b32.cont [15/16] %v3064_v11, 128 }
 0x24a   : > { %3113 = vxpose.xlu1.b32.end [16/16] %v3065_v50, 128 }
 0x26f   : > { %v3082_v35 = vpop.trf.xlu0 }
 0x270   : > { %3130 = vst [vmem:[%s5375_s5] sm:$0xff] %v3082_v35 }
 0x273   : > { %v3083_v31 = vpop.trf.xlu0 }
 0x274   : > { %3132 = vst [vmem:[%s5375_s5 + $0x10] sm:$0xff] %v3083_v31 }
 0x277   : > { %v3084_v6 = vpop.trf.xlu0 }
 0x278   : > { %3134 = vst [vmem:[%s5375_s5 + $0x20] sm:$0xff] %v3084_v6 }
 0x27b   : > { %v3085_v32 = vpop.trf.xlu0 }
 0x27c   : > { %3136 = vst [vmem:[%s5375_s5 + $0x30] sm:$0xff] %v3085_v32 }
 0x27f   : > { %v3086_v9 = vpop.trf.xlu0 }
 0x280   : > { %3138 = vst [vmem:[%s5375_s5 + $0x40] sm:$0xff] %v3086_v9 }
 0x283   : > { %v3087_v0 = vpop.trf.xlu0 }
 0x284   : > { %3140 = vst [vmem:[%s5375_s5 + $0x50] sm:$0xff] %v3087_v0 }
 0x287   : > { %v3088_v1 = vpop.trf.xlu0 }
 0x288   : > { %3142 = vst [vmem:[%s5375_s5 + $0x60] sm:$0xff] %v3088_v1 }
 0x28b   : > { %v3089_v21 = vpop.trf.xlu0 }
 0x28c   : > { %3144 = vst [vmem:[%s5375_s5 + $0x70] sm:$0xff] %v3089_v21 }
 0x28e   : > { %v3114_v12 = vpop.trf.xlu1 }
 0x28f   : > { %v3090_v5 = vpop.trf.xlu0  ;;  %3131 = vst [vmem:[%s5375_s5 + $0x8] sm:$0xff] %v3114_v12 }
 0x290   : > { %3146 = vst [vmem:[%s5375_s5 + $0x80] sm:$0xff] %v3090_v5 }
 0x292   : > { %v3115_v45 = vpop.trf.xlu1 }
 0x293   : > { %v3091_v26 = vpop.trf.xlu0  ;;  %3133 = vst [vmem:[%s5375_s5 + $0x18] sm:$0xff] %v3115_v45 }
 0x294   : > { %3148 = vst [vmem:[%s5375_s5 + $0x90] sm:$0xff] %v3091_v26 }
 0x296   : > { %v3116_v60 = vpop.trf.xlu1 }
 0x297   : > { %v3092_v46 = vpop.trf.xlu0  ;;  %3135 = vst [vmem:[%s5375_s5 + $0x28] sm:$0xff] %v3116_v60 }
 0x298   : > { %3150 = vst [vmem:[%s5375_s5 + $0xa0] sm:$0xff] %v3092_v46 }
 0x29a   : > { %v3117_v52 = vpop.trf.xlu1 }
 0x29b   : > { %v3093_v28 = vpop.trf.xlu0  ;;  %3137 = vst [vmem:[%s5375_s5 + $0x38] sm:$0xff] %v3117_v52 }
 0x29c   : > { %3152 = vst [vmem:[%s5375_s5 + $0xb0] sm:$0xff] %v3093_v28 }
 0x29e   : > { %v3118_v43 = vpop.trf.xlu1 }
 0x29f   : > { %v3094_v42 = vpop.trf.xlu0  ;;  %3139 = vst [vmem:[%s5375_s5 + $0x48] sm:$0xff] %v3118_v43 }
 0x2a0   : > { %3154 = vst [vmem:[%s5375_s5 + $0xc0] sm:$0xff] %v3094_v42 }
 0x2a2   : > { %v3119_v61 = vpop.trf.xlu1 }
 0x2a3   : > { %v3095_v27 = vpop.trf.xlu0  ;;  %3141 = vst [vmem:[%s5375_s5 + $0x58] sm:$0xff] %v3119_v61 }
 0x2a4   : > { %3156 = vst [vmem:[%s5375_s5 + $0xd0] sm:$0xff] %v3095_v27 }
 0x2a6   : > { %v3120_v51 = vpop.trf.xlu1 }
 0x2a7   : > { %v3096_v19 = vpop.trf.xlu0  ;;  %3143 = vst [vmem:[%s5375_s5 + $0x68] sm:$0xff] %v3120_v51 }
 0x2a8   : > { %3158 = vst [vmem:[%s5375_s5 + $0xe0] sm:$0xff] %v3096_v19 }
 0x2aa   : > { %v3121_v55 = vpop.trf.xlu1 }
 0x2ab   : > { %v3097_v47 = vpop.trf.xlu0  ;;  %3145 = vst [vmem:[%s5375_s5 + $0x78] sm:$0xff] %v3121_v55 }
 0x2ac   : > { %3160 = vst [vmem:[%s5375_s5 + $0xf0] sm:$0xff] %v3097_v47 }
 0x2ae   : > { %v3122_v33 = vpop.trf.xlu1 }
 0x2af   : > { %3147 = vst [vmem:[%s5375_s5 + $0x88] sm:$0xff] %v3122_v33 }
 0x2b2   : > { %v3123_v54 = vpop.trf.xlu1 }
 0x2b3   : > { %3149 = vst [vmem:[%s5375_s5 + $0x98] sm:$0xff] %v3123_v54 }
 0x2b6   : > { %v3124_v20 = vpop.trf.xlu1 }
 0x2b7   : > { %3151 = vst [vmem:[%s5375_s5 + $0xa8] sm:$0xff] %v3124_v20 }
 0x2ba   : > { %v3125_v18 = vpop.trf.xlu1 }
 0x2bb   : > { %3153 = vst [vmem:[%s5375_s5 + $0xb8] sm:$0xff] %v3125_v18 }
 0x2be   : > { %v3126_v48 = vpop.trf.xlu1 }
 0x2bf   : > { %3155 = vst [vmem:[%s5375_s5 + $0xc8] sm:$0xff] %v3126_v48 }
 0x2c2   : > { %v3127_v56 = vpop.trf.xlu1 }
 0x2c3   : > { %3157 = vst [vmem:[%s5375_s5 + $0xd8] sm:$0xff] %v3127_v56 }
 0x2c6   : > { %v3128_v38 = vpop.trf.xlu1 }
 0x2c7   : > { %3159 = vst [vmem:[%s5375_s5 + $0xe8] sm:$0xff] %v3128_v38 }
 0x2ca   : > { %v3129_v36 = vpop.trf.xlu1 }
 0x2cb   : > { %3161 = vst [vmem:[%s5375_s5 + $0xf8] sm:$0xff] %v3129_v36 }
 0x2cc PF: > { %s14_s15 = sadd.s32 1, %s4311_s15  }
 0x2cd   : > { %p11_p4 = scmp.ge.s32.totalorder %s14_s15, 4  }
 0x2cf   :  { %13 = sbr.rel (!%p11_p4) target bundleno = 1 (0x1), region = 70 }

</bundles_post_ra>
